<compile_context>
chip_gen: v7x
topology: tpu7x:2x2x1
jax: 0.10.0
libtpu: 0.0.40
codegen_flags: <defaults>
</compile_context>

<pallas_src>
import functools
import math

import jax
import jax.numpy as jnp
from jax import lax
from jax.experimental import pallas as pl
from jax.experimental.pallas import tpu as pltpu


def _head_indices(irreps_head):
    """Replicates AttnHeads2Vec.__init__: [(start, end), ...] per irrep."""
    idx = []
    start = 0
    for mul, ir_dim in irreps_head:
        idx.append((start, start + mul * ir_dim))
        start += mul * ir_dim
    return idx, start  # (segments, total head_dim)


def _sublane_granule(itemsize):
    # Native sublane tiles: f32 -> 8 rows, bf16 -> 16, int8/fp8 -> 32.
    return max(8, 32 // max(1, itemsize))


def _col_slices(head_indices, num_heads, head_dim, group):
    """Static (input_start, width) column slices, in output-column order.

    Packed layout: column g*H*D + h*D + d  <->  x[row*G + g, h, d].
    Output order inside a group: segment-major, then head (torch cat order).
    """
    HD = num_heads * head_dim
    slices = []
    for g in range(group):
        base = g * HD
        for (s, e) in head_indices:
            for h in range(num_heads):
                slices.append((base + h * head_dim + s, e - s))
    return slices


def _attn_heads2vec_kernel(x_ref, o_ref, *, col_slices, sub_rows, n_sub):
    # x_ref / o_ref: [row_tile, feat] lane-dense VMEM tiles (feat % 128 == 0
    # on the packed path).  Permutation is fully static: per sub-chunk, one
    # dense load, in-register lane slices + concat, one dense full-width store.
    def do(r0):
        xs = x_ref[pl.ds(r0, sub_rows), :]
        o_ref[pl.ds(r0, sub_rows), :] = jnp.concatenate(
            [xs[:, s:s + w] for (s, w) in col_slices], axis=-1)

    if n_sub == 1:
        do(0)
    else:
        # fori_loop (not a Python for) bounds live vregs to ~one sub-chunk.
        def body(i, carry):
            do(pl.multiple_of(i * sub_rows, sub_rows))
            return carry
        lax.fori_loop(0, n_sub, body, 0)


def _choose_tiles(rows, feat, itemsize, granule):
    """Pick (row_tile, sub_rows): ~1-2 MiB blocks for DMA efficiency,
    ~<=96 KiB in-register sub-chunks to bound vreg live ranges, and >=4 grid
    steps when the problem is big enough (>=2 blocks per TC on v7x)."""
    row_bytes = feat * itemsize
    sub = max(granule, ((96 * 1024) // row_bytes // granule) * granule)
    if rows <= sub:
        return rows, rows
    tile = max(sub, ((2 << 20) // row_bytes // sub) * sub)           # ~2 MiB
    if rows >= 4 * sub:
        quarter = max(sub, (rows // 4 // sub) * sub)                 # >=4 steps
        floor_1mib = max(sub, ((1 << 20) // row_bytes // sub) * sub)  # >=~1 MiB
        tile = min(tile, max(quarter, floor_1mib))
    tile = max(sub, min(tile, (rows // sub) * sub))
    return tile, sub


def attn_heads2vec(x, irreps_head):
    """x: [N, num_heads, head_dim]  ->  [N, num_heads * head_dim]."""
    head_indices, head_dim = _head_indices(irreps_head)
    N, H, D = x.shape
    assert D == head_dim, f"head_dim mismatch: {D} vs {head_dim}"
    HD = H * D

    # Fast paths: a single segment, or a single head, is exactly a head-major
    # flatten (identity permutation) -> pure reshape, no kernel launch.
    if len(head_indices) == 1 or H == 1 or N == 0:
        return x.reshape(N, HD)

    itemsize = jnp.dtype(x.dtype).itemsize
    granule = _sublane_granule(itemsize)

    # Lane packing: fold G rows into the lane axis so the block's last dim is
    # a multiple of 128 (full vregs, unmasked stores, full-width DMA rows).
    if HD % 128 == 0:
        G = 1
    else:
        G = 128 // math.gcd(HD, 128)
        if G * HD * itemsize > (256 << 10):   # keep packed rows reasonable
            G = 1

    x2 = x.reshape(N, HD)                      # contiguous, free in XLA
    n_pad = (-N) % G
    if n_pad:
        x2 = jnp.pad(x2, ((0, n_pad), (0, 0)))
    rows = (N + n_pad) // G
    feat = G * HD
    xp = x2.reshape(rows, feat)                # contiguous, free in XLA

    row_tile, sub_rows = _choose_tiles(rows, feat, itemsize, granule)
    n_sub = max(1, row_tile // sub_rows)
    grid = (pl.cdiv(rows, row_tile),)          # partial last block handled

    kernel = functools.partial(
        _attn_heads2vec_kernel,
        col_slices=_col_slices(head_indices, H, D, G),
        sub_rows=sub_rows, n_sub=n_sub)

    # Scoped VMEM: double-buffered in+out blocks plus headroom; cap at 48 MiB
    # so we never claim the whole v7x 64 MiB per-core envelope.
    block_bytes = row_tile * feat * itemsize
    vmem_limit = int(min(48 << 20, max(32 << 20, 4 * block_bytes + (4 << 20))))

    out = pl.pallas_call(
        kernel,
        out_shape=jax.ShapeDtypeStruct((rows, feat), x.dtype),
        grid_spec=pltpu.PrefetchScalarGridSpec(
            num_scalar_prefetch=0,
            grid=grid,
            in_specs=[pl.BlockSpec((row_tile, feat), lambda i: (i, 0))],
            out_specs=pl.BlockSpec((row_tile, feat), lambda i: (i, 0)),
        ),
        compiler_params=pltpu.CompilerParams(
            dimension_semantics=("parallel",),
            vmem_limit_bytes=vmem_limit,
        ),
        cost_estimate=pl.CostEstimate(
            flops=0, transcendentals=0,
            bytes_accessed=2 * rows * feat * itemsize),
    )(xp)

    out = out.reshape(N + n_pad, HD)
    if n_pad:
        out = out[:N]
    return out


def attn_heads2vec_ref(x, irreps_head):
    """Pure-JAX reference mirroring the PyTorch forward."""
    head_indices, _ = _head_indices(irreps_head)
    N = x.shape[0]
    return jnp.concatenate(
        [x[:, :, s:e].reshape(N, -1) for (s, e) in head_indices], axis=1)


if __name__ == "__main__":
    # irreps_head = "8x0e + 4x1e": segment widths 8*1=8 and 4*3=12 -> head_dim=20.
    irreps_head = [(8, 1), (4, 3)]
    H, D = 4, 20

    key = jax.random.PRNGKey(0)
    k1, k2, k3 = jax.random.split(key, 3)

    # Case 1: f32, N divisible by the lane-packing group (HD=80 -> G=8, 640 lanes).
    N1 = 256
    x1 = jax.random.normal(k1, (N1, H, D), dtype=jnp.float32)
    out1 = jax.block_until_ready(attn_heads2vec(x1, irreps_head))
    ref1 = attn_heads2vec_ref(x1, irreps_head)
    assert out1.shape == (N1, H * D), out1.shape
    assert jnp.array_equal(out1, ref1), "case 1 mismatch vs reference"

    # Case 2: bf16 (16-row sublane granule), N NOT divisible by the group (pad path).
    N2 = 203
    x2 = jax.random.normal(k2, (N2, H, D), dtype=jnp.float32).astype(jnp.bfloat16)
    out2 = jax.block_until_ready(attn_heads2vec(x2, irreps_head))
    ref2 = attn_heads2vec_ref(x2, irreps_head)
    assert out2.shape == (N2, H * D), out2.shape
    assert jnp.array_equal(out2, ref2), "case 2 mismatch vs reference"

    # Case 3: larger N -> multiple grid blocks + in-kernel sub-chunk loop.
    N3 = 8192
    x3 = jax.random.normal(k3, (N3, H, D), dtype=jnp.float32)
    out3 = jax.block_until_ready(attn_heads2vec(x3, irreps_head))
    ref3 = attn_heads2vec_ref(x3, irreps_head)
    assert jnp.array_equal(out3, ref3), "case 3 mismatch vs reference"

    # Case 4: single-segment and single-head fast paths (pure reshape).
    out4 = attn_heads2vec(x1[:, :, :8], [(8, 1)])
    assert jnp.array_equal(out4, x1[:, :, :8].reshape(N1, -1)), "fast path mismatch"
    out5 = attn_heads2vec(x1[:, :1, :], irreps_head)
    assert jnp.array_equal(out5, attn_heads2vec_ref(x1[:, :1, :], irreps_head)), \
        "H==1 fast path mismatch"

    print("KERNEL_OK")
</pallas_src>

<mosaic_0001>
module attributes {stable_mosaic.version = 11 : i64} {
  func.func @_attn_heads2vec_kernel(%arg0: i32, %arg1: memref<32x640xf32, #tpu.memory_space<vmem>>, %arg2: memref<32x640xf32, #tpu.memory_space<vmem>>) attributes {dimension_semantics = [#tpu.dimension_semantics<parallel>], iteration_bounds = array<i64: 1>, scalar_prefetch = 0 : i64, scratch_operands = 0 : i64, tpu.core_type = #tpu.core_type<tc>, window_params = [{transform_indices = @transform_0, window_bounds = array<i64: 32, 640>}, {transform_indices = @transform_1, window_bounds = array<i64: 32, 640>}]} {
    %c0 = arith.constant 0 : index
    %c0_0 = arith.constant 0 : index
    %0 = vector.load %arg1[%c0, %c0_0] : memref<32x640xf32, #tpu.memory_space<vmem>>, vector<32x640xf32>
    %1 = vector.extract_strided_slice %0 {offsets = [0, 0], sizes = [32, 8], strides = [1, 1]} : vector<32x640xf32> to vector<32x8xf32>
    %2 = vector.extract_strided_slice %0 {offsets = [0, 20], sizes = [32, 8], strides = [1, 1]} : vector<32x640xf32> to vector<32x8xf32>
    %3 = vector.extract_strided_slice %0 {offsets = [0, 40], sizes = [32, 8], strides = [1, 1]} : vector<32x640xf32> to vector<32x8xf32>
    %4 = vector.extract_strided_slice %0 {offsets = [0, 60], sizes = [32, 8], strides = [1, 1]} : vector<32x640xf32> to vector<32x8xf32>
    %5 = vector.extract_strided_slice %0 {offsets = [0, 8], sizes = [32, 12], strides = [1, 1]} : vector<32x640xf32> to vector<32x12xf32>
    %6 = vector.extract_strided_slice %0 {offsets = [0, 28], sizes = [32, 12], strides = [1, 1]} : vector<32x640xf32> to vector<32x12xf32>
    %7 = vector.extract_strided_slice %0 {offsets = [0, 48], sizes = [32, 12], strides = [1, 1]} : vector<32x640xf32> to vector<32x12xf32>
    %8 = vector.extract_strided_slice %0 {offsets = [0, 68], sizes = [32, 12], strides = [1, 1]} : vector<32x640xf32> to vector<32x12xf32>
    %9 = vector.extract_strided_slice %0 {offsets = [0, 80], sizes = [32, 8], strides = [1, 1]} : vector<32x640xf32> to vector<32x8xf32>
    %10 = vector.extract_strided_slice %0 {offsets = [0, 100], sizes = [32, 8], strides = [1, 1]} : vector<32x640xf32> to vector<32x8xf32>
    %11 = vector.extract_strided_slice %0 {offsets = [0, 120], sizes = [32, 8], strides = [1, 1]} : vector<32x640xf32> to vector<32x8xf32>
    %12 = vector.extract_strided_slice %0 {offsets = [0, 140], sizes = [32, 8], strides = [1, 1]} : vector<32x640xf32> to vector<32x8xf32>
    %13 = vector.extract_strided_slice %0 {offsets = [0, 88], sizes = [32, 12], strides = [1, 1]} : vector<32x640xf32> to vector<32x12xf32>
    %14 = vector.extract_strided_slice %0 {offsets = [0, 108], sizes = [32, 12], strides = [1, 1]} : vector<32x640xf32> to vector<32x12xf32>
    %15 = vector.extract_strided_slice %0 {offsets = [0, 128], sizes = [32, 12], strides = [1, 1]} : vector<32x640xf32> to vector<32x12xf32>
    %16 = vector.extract_strided_slice %0 {offsets = [0, 148], sizes = [32, 12], strides = [1, 1]} : vector<32x640xf32> to vector<32x12xf32>
    %17 = vector.extract_strided_slice %0 {offsets = [0, 160], sizes = [32, 8], strides = [1, 1]} : vector<32x640xf32> to vector<32x8xf32>
    %18 = vector.extract_strided_slice %0 {offsets = [0, 180], sizes = [32, 8], strides = [1, 1]} : vector<32x640xf32> to vector<32x8xf32>
    %19 = vector.extract_strided_slice %0 {offsets = [0, 200], sizes = [32, 8], strides = [1, 1]} : vector<32x640xf32> to vector<32x8xf32>
    %20 = vector.extract_strided_slice %0 {offsets = [0, 220], sizes = [32, 8], strides = [1, 1]} : vector<32x640xf32> to vector<32x8xf32>
    %21 = vector.extract_strided_slice %0 {offsets = [0, 168], sizes = [32, 12], strides = [1, 1]} : vector<32x640xf32> to vector<32x12xf32>
    %22 = vector.extract_strided_slice %0 {offsets = [0, 188], sizes = [32, 12], strides = [1, 1]} : vector<32x640xf32> to vector<32x12xf32>
    %23 = vector.extract_strided_slice %0 {offsets = [0, 208], sizes = [32, 12], strides = [1, 1]} : vector<32x640xf32> to vector<32x12xf32>
    %24 = vector.extract_strided_slice %0 {offsets = [0, 228], sizes = [32, 12], strides = [1, 1]} : vector<32x640xf32> to vector<32x12xf32>
    %25 = vector.extract_strided_slice %0 {offsets = [0, 240], sizes = [32, 8], strides = [1, 1]} : vector<32x640xf32> to vector<32x8xf32>
    %26 = vector.extract_strided_slice %0 {offsets = [0, 260], sizes = [32, 8], strides = [1, 1]} : vector<32x640xf32> to vector<32x8xf32>
    %27 = vector.extract_strided_slice %0 {offsets = [0, 280], sizes = [32, 8], strides = [1, 1]} : vector<32x640xf32> to vector<32x8xf32>
    %28 = vector.extract_strided_slice %0 {offsets = [0, 300], sizes = [32, 8], strides = [1, 1]} : vector<32x640xf32> to vector<32x8xf32>
    %29 = vector.extract_strided_slice %0 {offsets = [0, 248], sizes = [32, 12], strides = [1, 1]} : vector<32x640xf32> to vector<32x12xf32>
    %30 = vector.extract_strided_slice %0 {offsets = [0, 268], sizes = [32, 12], strides = [1, 1]} : vector<32x640xf32> to vector<32x12xf32>
    %31 = vector.extract_strided_slice %0 {offsets = [0, 288], sizes = [32, 12], strides = [1, 1]} : vector<32x640xf32> to vector<32x12xf32>
    %32 = vector.extract_strided_slice %0 {offsets = [0, 308], sizes = [32, 12], strides = [1, 1]} : vector<32x640xf32> to vector<32x12xf32>
    %33 = vector.extract_strided_slice %0 {offsets = [0, 320], sizes = [32, 8], strides = [1, 1]} : vector<32x640xf32> to vector<32x8xf32>
    %34 = vector.extract_strided_slice %0 {offsets = [0, 340], sizes = [32, 8], strides = [1, 1]} : vector<32x640xf32> to vector<32x8xf32>
    %35 = vector.extract_strided_slice %0 {offsets = [0, 360], sizes = [32, 8], strides = [1, 1]} : vector<32x640xf32> to vector<32x8xf32>
    %36 = vector.extract_strided_slice %0 {offsets = [0, 380], sizes = [32, 8], strides = [1, 1]} : vector<32x640xf32> to vector<32x8xf32>
    %37 = vector.extract_strided_slice %0 {offsets = [0, 328], sizes = [32, 12], strides = [1, 1]} : vector<32x640xf32> to vector<32x12xf32>
    %38 = vector.extract_strided_slice %0 {offsets = [0, 348], sizes = [32, 12], strides = [1, 1]} : vector<32x640xf32> to vector<32x12xf32>
    %39 = vector.extract_strided_slice %0 {offsets = [0, 368], sizes = [32, 12], strides = [1, 1]} : vector<32x640xf32> to vector<32x12xf32>
    %40 = vector.extract_strided_slice %0 {offsets = [0, 388], sizes = [32, 12], strides = [1, 1]} : vector<32x640xf32> to vector<32x12xf32>
    %41 = vector.extract_strided_slice %0 {offsets = [0, 400], sizes = [32, 8], strides = [1, 1]} : vector<32x640xf32> to vector<32x8xf32>
    %42 = vector.extract_strided_slice %0 {offsets = [0, 420], sizes = [32, 8], strides = [1, 1]} : vector<32x640xf32> to vector<32x8xf32>
    %43 = vector.extract_strided_slice %0 {offsets = [0, 440], sizes = [32, 8], strides = [1, 1]} : vector<32x640xf32> to vector<32x8xf32>
    %44 = vector.extract_strided_slice %0 {offsets = [0, 460], sizes = [32, 8], strides = [1, 1]} : vector<32x640xf32> to vector<32x8xf32>
    %45 = vector.extract_strided_slice %0 {offsets = [0, 408], sizes = [32, 12], strides = [1, 1]} : vector<32x640xf32> to vector<32x12xf32>
    %46 = vector.extract_strided_slice %0 {offsets = [0, 428], sizes = [32, 12], strides = [1, 1]} : vector<32x640xf32> to vector<32x12xf32>
    %47 = vector.extract_strided_slice %0 {offsets = [0, 448], sizes = [32, 12], strides = [1, 1]} : vector<32x640xf32> to vector<32x12xf32>
    %48 = vector.extract_strided_slice %0 {offsets = [0, 468], sizes = [32, 12], strides = [1, 1]} : vector<32x640xf32> to vector<32x12xf32>
    %49 = vector.extract_strided_slice %0 {offsets = [0, 480], sizes = [32, 8], strides = [1, 1]} : vector<32x640xf32> to vector<32x8xf32>
    %50 = vector.extract_strided_slice %0 {offsets = [0, 500], sizes = [32, 8], strides = [1, 1]} : vector<32x640xf32> to vector<32x8xf32>
    %51 = vector.extract_strided_slice %0 {offsets = [0, 520], sizes = [32, 8], strides = [1, 1]} : vector<32x640xf32> to vector<32x8xf32>
    %52 = vector.extract_strided_slice %0 {offsets = [0, 540], sizes = [32, 8], strides = [1, 1]} : vector<32x640xf32> to vector<32x8xf32>
    %53 = vector.extract_strided_slice %0 {offsets = [0, 488], sizes = [32, 12], strides = [1, 1]} : vector<32x640xf32> to vector<32x12xf32>
    %54 = vector.extract_strided_slice %0 {offsets = [0, 508], sizes = [32, 12], strides = [1, 1]} : vector<32x640xf32> to vector<32x12xf32>
    %55 = vector.extract_strided_slice %0 {offsets = [0, 528], sizes = [32, 12], strides = [1, 1]} : vector<32x640xf32> to vector<32x12xf32>
    %56 = vector.extract_strided_slice %0 {offsets = [0, 548], sizes = [32, 12], strides = [1, 1]} : vector<32x640xf32> to vector<32x12xf32>
    %57 = vector.extract_strided_slice %0 {offsets = [0, 560], sizes = [32, 8], strides = [1, 1]} : vector<32x640xf32> to vector<32x8xf32>
    %58 = vector.extract_strided_slice %0 {offsets = [0, 580], sizes = [32, 8], strides = [1, 1]} : vector<32x640xf32> to vector<32x8xf32>
    %59 = vector.extract_strided_slice %0 {offsets = [0, 600], sizes = [32, 8], strides = [1, 1]} : vector<32x640xf32> to vector<32x8xf32>
    %60 = vector.extract_strided_slice %0 {offsets = [0, 620], sizes = [32, 8], strides = [1, 1]} : vector<32x640xf32> to vector<32x8xf32>
    %61 = vector.extract_strided_slice %0 {offsets = [0, 568], sizes = [32, 12], strides = [1, 1]} : vector<32x640xf32> to vector<32x12xf32>
    %62 = vector.extract_strided_slice %0 {offsets = [0, 588], sizes = [32, 12], strides = [1, 1]} : vector<32x640xf32> to vector<32x12xf32>
    %63 = vector.extract_strided_slice %0 {offsets = [0, 608], sizes = [32, 12], strides = [1, 1]} : vector<32x640xf32> to vector<32x12xf32>
    %64 = vector.extract_strided_slice %0 {offsets = [0, 628], sizes = [32, 12], strides = [1, 1]} : vector<32x640xf32> to vector<32x12xf32>
    %65 = tpu.concatenate %1, %2, %3, %4, %5, %6, %7, %8, %9, %10, %11, %12, %13, %14, %15, %16 in 1 : vector<32x8xf32>, vector<32x8xf32>, vector<32x8xf32>, vector<32x8xf32>, vector<32x12xf32>, vector<32x12xf32>, vector<32x12xf32>, vector<32x12xf32>, vector<32x8xf32>, vector<32x8xf32>, vector<32x8xf32>, vector<32x8xf32>, vector<32x12xf32>, vector<32x12xf32>, vector<32x12xf32>, vector<32x12xf32> -> vector<32x160xf32>
    %66 = tpu.concatenate %17, %18, %19, %20, %21, %22, %23, %24, %25, %26, %27, %28, %29, %30, %31, %32 in 1 : vector<32x8xf32>, vector<32x8xf32>, vector<32x8xf32>, vector<32x8xf32>, vector<32x12xf32>, vector<32x12xf32>, vector<32x12xf32>, vector<32x12xf32>, vector<32x8xf32>, vector<32x8xf32>, vector<32x8xf32>, vector<32x8xf32>, vector<32x12xf32>, vector<32x12xf32>, vector<32x12xf32>, vector<32x12xf32> -> vector<32x160xf32>
    %67 = tpu.concatenate %33, %34, %35, %36, %37, %38, %39, %40, %41, %42, %43, %44, %45, %46, %47, %48 in 1 : vector<32x8xf32>, vector<32x8xf32>, vector<32x8xf32>, vector<32x8xf32>, vector<32x12xf32>, vector<32x12xf32>, vector<32x12xf32>, vector<32x12xf32>, vector<32x8xf32>, vector<32x8xf32>, vector<32x8xf32>, vector<32x8xf32>, vector<32x12xf32>, vector<32x12xf32>, vector<32x12xf32>, vector<32x12xf32> -> vector<32x160xf32>
    %68 = tpu.concatenate %49, %50, %51, %52, %53, %54, %55, %56, %57, %58, %59, %60, %61, %62, %63, %64 in 1 : vector<32x8xf32>, vector<32x8xf32>, vector<32x8xf32>, vector<32x8xf32>, vector<32x12xf32>, vector<32x12xf32>, vector<32x12xf32>, vector<32x12xf32>, vector<32x8xf32>, vector<32x8xf32>, vector<32x8xf32>, vector<32x8xf32>, vector<32x12xf32>, vector<32x12xf32>, vector<32x12xf32>, vector<32x12xf32> -> vector<32x160xf32>
    %69 = tpu.concatenate %65, %66, %67, %68 in 1 : vector<32x160xf32>, vector<32x160xf32>, vector<32x160xf32>, vector<32x160xf32> -> vector<32x640xf32>
    %c0_1 = arith.constant 0 : index
    %c0_2 = arith.constant 0 : index
    %70 = vector.load %arg2[%c0_1, %c0_2] : memref<32x640xf32, #tpu.memory_space<vmem>>, vector<32x640xf32>
    tpu.vector_store %arg2[%c0_1, %c0_2], %69 {strides = array<i32>} : memref<32x640xf32, #tpu.memory_space<vmem>>, vector<32x640xf32>,
    return
  }
  func.func @transform_0(%arg0: i32) -> (i32, i32) {
    %c0_i32 = arith.constant 0 : i32
    %c0_i32_0 = arith.constant 0 : i32
    return %arg0, %c0_i32 : i32, i32
  }
  func.func @transform_1(%arg0: i32) -> (i32, i32) {
    %c0_i32 = arith.constant 0 : i32
    %c0_i32_0 = arith.constant 0 : i32
    return %arg0, %c0_i32 : i32, i32
  }
}

</mosaic_0001>

<bundles_post_ra>
// kernel: tpu_custom_call.1
= control target key start
LH: loop header
LB: loop body
LE: loop exit
PB: predicated region body
PF: predicated region fallthrough
CT: control target
= control target key end

     0   :  { %6 = vsyncpa [#allocation3], 0  ;;  %s2280_s0 = inlined_call_operand.hbm [shape: f32[32,640], index: 0, kind: input, shape index: {}]   ;;  %s2281_s1 = inlined_call_operand.hbm [shape: f32[32,640], index: 1, kind: output, shape index: {}]  }
   0x1   :  { %7 = vsyncpa [#allocation4], 0  ;;  %s1120_s6 = smov [#allocation2]   ;;  %s1072_s10 = scalar_lea.hbm %s2280_s0, 2560 }
   0x2   :  { %s13_s7 = sshll.u32 %s1120_s6, 4  ;;  %p1073_p0 = scmp.ne.s32.totalorder %s2280_s0, %s1072_s10  ;;  %s14_s7 = int_to_ptr.vmem [resolvable:$true] %s13_s7 }
   0x3   :  { %p1076_p1 = scmp.lt.u32.totalorder %s1072_s10, %s2280_s0 }
   0x5   :  { %p1078_p2 = pnand %p1076_p1, %p1073_p0 }
   0x7   :  { %1081 = shalt.err (!%p1078_p2)
}
   0x8   :  { %s1082_s15 = scalar_lea.vmem %s14_s7, 2560  ;;  %p1087_p4 = scmp.lt.s32.totalorder %s14_s7, %s14_s7 }
   0x9   :  { %p1083_p3 = scmp.ne.s32.totalorder %s14_s7, %s1082_s15  ;;  %p1088_p5 = scmp.lt.s32.totalorder %s1082_s15, %s1082_s15 }
   0xb   :  { %p1089_p6 = por %p1088_p5, %p1087_p4 }
   0xd   :  { %p1090_p7 = pnand %p1089_p6, %p1083_p3 }
   0xf   :  { %1093 = shalt.err (!%p1090_p7)
}
  0x10   :  { %s1121_s16 = smov 640   ;;  %s1122_s17 = smov 40  }
  0x11   :  { %19 = dma.hbm_to_vmem [thread:$0]  %s2280_s0, 2560, %s14_s7, [#allocation3], %s1121_s16, %s1121_s16, %s1122_s17  }
  0x12   :  { %1116 = dma.done.wait [#allocation3], 2560  }
  0x13   :  { %1117 = vsyncadd [#allocation3], 4294964736  ;;  %v1171_v0 = vld [vmem:[#allocation2 + $0x50] sm:$0xff]  ;;  %v1173_v1 = vld [vmem:[#allocation2] sm:$0xff]  ;;  %s1123_s20 = smov 116   ;;  %s1124_s0 = smov 104  }
  0x14   :  { %51 = vrot.lane.b32.xlu1 %v1171_v0, %s1123_s20  ;;  %47 = vrot.lane.b32.xlu0 %v1173_v1, %s1123_s20  ;;  %v1177_v2 = vld [vmem:[#allocation2 + $0x78] sm:$0xff]  ;;  %v1179_v3 = vld [vmem:[#allocation2 + $0x28] sm:$0xff]  ;;  %s1125_s21 = smov 92   ;;  %s1126_s22 = smov 24   ;;  %v29_v4 = vld [vmem:[#allocation2 + $0x30] sm:$0xff]  ;;  %vm147_vm0 = vcmask 64512  }
  0x15   :  { %s1127_s23 = smov 16   ;;  %s1128_s24 = smov 8   ;;  %v24_v5 = vld [vmem:[#allocation2 + $0x8] sm:$0xff]  ;;  %v39_v6 = vld [vmem:[#allocation2 + $0x80] sm:$0xff]  ;;  %v34_v7 = vld [vmem:[#allocation2 + $0x58] sm:$0xff]  ;;  %vm152_vm1 = vcmask 130048  }
  0x16   :  { %s1129_s25 = smov 96   ;;  %s1130_s26 = smov 84   ;;  %v1247_v10 = vld [vmem:[#allocation2 + $0x38] sm:$0xff]  ;;  %v1249_v11 = vld [vmem:[#allocation2 + $0x10] sm:$0xff]  ;;  %v1259_v14 = vld [vmem:[#allocation2 + $0x88] sm:$0xff]  ;;  %vm157_vm2 = vcmask 195584  }
  0x17   :  { %s1131_s27 = smov 72   ;;  %s1132_s28 = smov 60   ;;  %v1261_v15 = vld [vmem:[#allocation2 + $0x60] sm:$0xff]  ;;  %vm162_vm3 = vcmask 261120   ;;  %vm167_vm4 = vcmask 359424   ;;  %vm172_vm5 = vcmask 457728  }
  0x18   :  { %53 = vrot.lane.b32.xlu1 %v1177_v2, %s1123_s20  ;;  %49 = vrot.lane.b32.xlu0 %v1179_v3, %s1123_s20  ;;  %s1133_s29 = smov 120   ;;  %s1134_s30 = smov 112   ;;  %vm177_vm6 = vcmask 556032   ;;  %vm182_vm7 = vcmask 654336   ;;  %vm187_vm8 = vcmask 719872   ;;  %vm192_vm9 = vcmask 785408  }
  0x19   :  { %vm197_vm10 = vcmask 850944   ;;  %vm202_vm11 = vcmask 916480   ;;  %vm207_vm12 = vcmask 1014784   ;;  %s1135_s2 = smov 64   ;;  %s1136_s3 = smov 52   ;;  %vm353_vm13 = vcmask 982016  }
  0x1a   :  { %s1137_s4 = smov 28   ;;  %s1138_s5 = smov 88   ;;  %vm514_vm14 = vcmask 228352   ;;  %vm216_vm15 = vcmask 162816  }
  0x1b   :  { %s1139_s6 = smov 80   ;;  %s1140_s7 = smov 32  }
  0x1c   :  { %61 = vrot.lane.b32.xlu1 %v1179_v3, %s1124_s0  ;;  %59 = vrot.lane.b32.xlu0 %v1173_v1, %s1124_s0  ;;  %s1141_s8 = smov 20   ;;  %s1142_s9 = smov 124  }
  0x1d   :  { %s1143_s10 = smov 56   ;;  %s1144_s11 = smov 48  }
  0x1e   :  { %s1145_s12 = smov [#allocation5]  }
  0x1f   :  { %s1030_s13 = sshll.u32 %s1145_s12, 4  ;;  %s1031_s13 = int_to_ptr.vmem [resolvable:$true] %s1030_s13 }
  0x20   :  { %65 = vrot.lane.b32.xlu1 %v1177_v2, %s1124_s0  ;;  %63 = vrot.lane.b32.xlu0 %v1171_v0, %s1124_s0  ;;  %s1094_s14 = scalar_lea.vmem %s1031_s13, 2560  ;;  %p1099_p9 = scmp.lt.s32.totalorder %s1031_s13, %s1031_s13 }
  0x21   :  { %p1095_p8 = scmp.ne.s32.totalorder %s1031_s13, %s1094_s14  ;;  %p1100_p10 = scmp.lt.s32.totalorder %s1094_s14, %s1094_s14 }
  0x23   :  { %p1101_p11 = por %p1100_p10, %p1099_p9 }
  0x24   :  { %73 = vrot.lane.b32.xlu1 %v1179_v3, %s1125_s21  ;;  %71 = vrot.lane.b32.xlu0 %v1173_v1, %s1125_s21 }
  0x25   :  { %p1102_p12 = pnand %p1101_p11, %p1095_p8 }
  0x28   :  { %77 = vrot.lane.b32.xlu1 %v1177_v2, %s1125_s21  ;;  %75 = vrot.lane.b32.xlu0 %v1171_v0, %s1125_s21 }
  0x2c   :  { %85 = vrot.lane.b32.xlu1 %v1179_v3, %s1126_s22  ;;  %83 = vrot.lane.b32.xlu0 %v1173_v1, %s1126_s22 }
  0x30   :  { %89 = vrot.lane.b32.xlu1 %v1177_v2, %s1126_s22  ;;  %87 = vrot.lane.b32.xlu0 %v1171_v0, %s1126_s22 }
  0x34   :  { %97 = vrot.lane.b32.xlu1 %v1179_v3, %s1127_s23  ;;  %95 = vrot.lane.b32.xlu0 %v1173_v1, %s1127_s23 }
  0x38   :  { %101 = vrot.lane.b32.xlu1 %v1177_v2, %s1127_s23  ;;  %99 = vrot.lane.b32.xlu0 %v1171_v0, %s1127_s23 }
  0x3c   :  { %109 = vrot.lane.b32.xlu1 %v1179_v3, %s1128_s24  ;;  %107 = vrot.lane.b32.xlu0 %v1173_v1, %s1128_s24 }
  0x40   :  { %113 = vrot.lane.b32.xlu1 %v1177_v2, %s1128_s24  ;;  %111 = vrot.lane.b32.xlu0 %v1171_v0, %s1128_s24 }
  0x44   :  { %125 = vrot.lane.b32.xlu1 %v29_v4, %s1125_s21  ;;  %123 = vrot.lane.b32.xlu0 %v24_v5, %s1125_s21 }
  0x48   :  { %129 = vrot.lane.b32.xlu1 %v39_v6, %s1125_s21  ;;  %127 = vrot.lane.b32.xlu0 %v34_v7, %s1125_s21 }
  0x4c   :  { %137 = vrot.lane.b32.xlu1 %v29_v4, %s1128_s24  ;;  %135 = vrot.lane.b32.xlu0 %v24_v5, %s1128_s24 }
  0x50   :  { %141 = vrot.lane.b32.xlu1 %v39_v6, %s1128_s24  ;;  %139 = vrot.lane.b32.xlu0 %v34_v7, %s1128_s24 }
  0x54   :  { %223 = vrot.lane.b32.xlu1 %v29_v4, %s1129_s25  ;;  %221 = vrot.lane.b32.xlu0 %v24_v5, %s1129_s25 }
  0x58   :  { %227 = vrot.lane.b32.xlu1 %v39_v6, %s1129_s25  ;;  %225 = vrot.lane.b32.xlu0 %v34_v7, %s1129_s25 }
  0x5c   :  { %235 = vrot.lane.b32.xlu1 %v29_v4, %s1130_s26  ;;  %233 = vrot.lane.b32.xlu0 %v24_v5, %s1130_s26 }
  0x60   :  { %239 = vrot.lane.b32.xlu1 %v39_v6, %s1130_s26  ;;  %237 = vrot.lane.b32.xlu0 %v34_v7, %s1130_s26 }
  0x64   :  { %247 = vrot.lane.b32.xlu1 %v29_v4, %s1131_s27  ;;  %245 = vrot.lane.b32.xlu0 %v24_v5, %s1131_s27 }
  0x68   :  { %251 = vrot.lane.b32.xlu1 %v39_v6, %s1131_s27  ;;  %249 = vrot.lane.b32.xlu0 %v34_v7, %s1131_s27 }
  0x6c   :  { %259 = vrot.lane.b32.xlu1 %v29_v4, %s1132_s28  ;;  %257 = vrot.lane.b32.xlu0 %v24_v5, %s1132_s28 }
  0x70   :  { %263 = vrot.lane.b32.xlu1 %v39_v6, %s1132_s28  ;;  %261 = vrot.lane.b32.xlu0 %v34_v7, %s1132_s28 }
  0x74   :  { %271 = vrot.lane.b32.xlu1 %v29_v4, %s1133_s29  ;;  %269 = vrot.lane.b32.xlu0 %v24_v5, %s1133_s29 }
  0x78   :  { %275 = vrot.lane.b32.xlu1 %v39_v6, %s1133_s29  ;;  %273 = vrot.lane.b32.xlu0 %v34_v7, %s1133_s29 }
  0x7c   :  { %283 = vrot.lane.b32.xlu1 %v29_v4, %s1134_s30  ;;  %281 = vrot.lane.b32.xlu0 %v24_v5, %s1134_s30 }
  0x80   :  { %287 = vrot.lane.b32.xlu1 %v39_v6, %s1134_s30  ;;  %285 = vrot.lane.b32.xlu0 %v34_v7, %s1134_s30 }
  0x84   :  { %295 = vrot.lane.b32.xlu1 %v29_v4, %s1124_s0  ;;  %293 = vrot.lane.b32.xlu0 %v24_v5, %s1124_s0 }
  0x86   :  { %v1241_v8 = vpop.permute.xlu1 %51  ;;  %v1243_v9 = vpop.permute.xlu0 %47 }
  0x87   :  { %v148_v30 = vsel %vm147_vm0, %v1173_v1, %v1243_v9  ;;  %v150_v41 = vsel %vm147_vm0, %v1171_v0, %v1241_v8 }
  0x88   :  { %299 = vrot.lane.b32.xlu1 %v39_v6, %s1124_s0  ;;  %297 = vrot.lane.b32.xlu0 %v34_v7, %s1124_s0 }
  0x8a   :  { %v1251_v12 = vpop.permute.xlu1 %53  ;;  %v1253_v13 = vpop.permute.xlu0 %49 }
  0x8b   :  { %v149_v31 = vsel %vm147_vm0, %v1179_v3, %v1253_v13  ;;  %v151_v38 = vsel %vm147_vm0, %v1177_v2, %v1251_v12 }
  0x8c   :  { %311 = vrot.lane.b32.xlu1 %v1247_v10, %s1130_s26  ;;  %309 = vrot.lane.b32.xlu0 %v1249_v11, %s1130_s26 }
  0x8e   :  { %v1263_v16 = vpop.permute.xlu1 %61  ;;  %v1265_v17 = vpop.permute.xlu0 %59 }
  0x8f   :  { %v154_v34 = vsel %vm152_vm1, %v149_v31, %v1263_v16  ;;  %v153_v35 = vsel %vm152_vm1, %v148_v30, %v1265_v17 }
  0x90   :  { %315 = vrot.lane.b32.xlu1 %v1259_v14, %s1130_s26  ;;  %313 = vrot.lane.b32.xlu0 %v1261_v15, %s1130_s26 }
  0x92   :  { %v1271_v18 = vpop.permute.xlu1 %65  ;;  %v1273_v19 = vpop.permute.xlu0 %63 }
  0x93   :  { %v156_v42 = vsel %vm152_vm1, %v151_v38, %v1271_v18  ;;  %v155_v47 = vsel %vm152_vm1, %v150_v41, %v1273_v19 }
  0x94   :  { %323 = vrot.lane.b32.xlu1 %v1247_v10, %s1131_s27  ;;  %321 = vrot.lane.b32.xlu0 %v1249_v11, %s1131_s27 }
  0x96   :  { %v74_v20 = vpop.permute.xlu1 %73  ;;  %v72_v21 = vpop.permute.xlu0 %71 }
  0x97   :  { %v159_v36 = vsel %vm157_vm2, %v154_v34, %v74_v20  ;;  %v158_v37 = vsel %vm157_vm2, %v153_v35, %v72_v21 }
  0x98   :  { %327 = vrot.lane.b32.xlu1 %v1259_v14, %s1131_s27  ;;  %325 = vrot.lane.b32.xlu0 %v1261_v15, %s1131_s27 }
  0x9a   :  { %v78_v22 = vpop.permute.xlu1 %77  ;;  %v76_v23 = vpop.permute.xlu0 %75 }
  0x9b   :  { %v161_v48 = vsel %vm157_vm2, %v156_v42, %v78_v22  ;;  %v160_v51 = vsel %vm157_vm2, %v155_v47, %v76_v23 }
  0x9c   :  { %335 = vrot.lane.b32.xlu1 %v1247_v10, %s1132_s28  ;;  %333 = vrot.lane.b32.xlu0 %v1249_v11, %s1132_s28 }
  0x9e   :  { %v1287_v24 = vpop.permute.xlu1 %85  ;;  %v1289_v25 = vpop.permute.xlu0 %83 }
  0x9f   :  { %v164_v39 = vsel %vm162_vm3, %v159_v36, %v1287_v24  ;;  %v163_v40 = vsel %vm162_vm3, %v158_v37, %v1289_v25 }
  0xa0   :  { %339 = vrot.lane.b32.xlu1 %v1259_v14, %s1132_s28  ;;  %337 = vrot.lane.b32.xlu0 %v1261_v15, %s1132_s28 }
  0xa2   :  { %v1295_v26 = vpop.permute.xlu1 %89  ;;  %v1297_v27 = vpop.permute.xlu0 %87 }
  0xa3   :  { %v166_v54 = vsel %vm162_vm3, %v161_v48, %v1295_v26  ;;  %v165_v55 = vsel %vm162_vm3, %v160_v51, %v1297_v27 }
  0xa4   :  { %347 = vrot.lane.b32.xlu1 %v1247_v10, %s1133_s29  ;;  %345 = vrot.lane.b32.xlu0 %v1249_v11, %s1133_s29 }
  0xa6   :  { %v1303_v28 = vpop.permute.xlu1 %97  ;;  %v1305_v29 = vpop.permute.xlu0 %95 }
  0xa7   :  { %2294 = vst [vmem:[#allocation8_spill] sm:$0xff] %v1303_v28  ;;  %2295 = vst [vmem:[#allocation9_spill] sm:$0xff] %v1305_v29  ;;  %v169_v44 = vsel %vm167_vm4, %v164_v39, %v1303_v28  ;;  %v168_v45 = vsel %vm167_vm4, %v163_v40, %v1305_v29 }
  0xa8   :  { %351 = vrot.lane.b32.xlu1 %v1259_v14, %s1133_s29  ;;  %349 = vrot.lane.b32.xlu0 %v1261_v15, %s1133_s29 }
  0xaa   :  { %v1317_v32 = vpop.permute.xlu1 %101  ;;  %v1319_v33 = vpop.permute.xlu0 %99 }
  0xab   :  { %2296 = vst [vmem:[#allocation10_spill] sm:$0xff] %v1317_v32  ;;  %2297 = vst [vmem:[#allocation11_spill] sm:$0xff] %v1319_v33  ;;  %v171_v58 = vsel %vm167_vm4, %v166_v54, %v1317_v32  ;;  %v170_v60 = vsel %vm167_vm4, %v165_v55, %v1319_v33 }
  0xac   :  { %364 = vrot.lane.b32.xlu1 %v1247_v10, %s1134_s30  ;;  %362 = vrot.lane.b32.xlu0 %v1249_v11, %s1134_s30 }
  0xae   :  { %v110_v43 = vpop.permute.xlu1 %109  ;;  %v108_v46 = vpop.permute.xlu0 %107 }
  0xaf   :  { %v174_v49 = vsel %vm172_vm5, %v169_v44, %v110_v43  ;;  %v173_v50 = vsel %vm172_vm5, %v168_v45, %v108_v46 }
  0xb0   :  { %v179_v52 = vsel %vm177_vm6, %v174_v49, %v1179_v3  ;;  %v178_v53 = vsel %vm177_vm6, %v173_v50, %v1173_v1  ;;  %368 = vrot.lane.b32.xlu1 %v1259_v14, %s1134_s30  ;;  %366 = vrot.lane.b32.xlu0 %v1261_v15, %s1134_s30  ;;  %v1487_v50 = vld [vmem:[#allocation2 + $0x18] sm:$0xff] }
  0xb1   :  { %v184_v56 = vsel %vm182_vm7, %v179_v52, %v1179_v3  ;;  %v183_v57 = vsel %vm182_vm7, %v178_v53, %v1173_v1  ;;  %v1495_v53 = vld [vmem:[#allocation2 + $0x40] sm:$0xff] }
  0xb2   :  { %v114_v59 = vpop.permute.xlu1 %113  ;;  %v112_v61 = vpop.permute.xlu0 %111  ;;  %v189_v4 = vsel %vm187_vm8, %v184_v56, %v1253_v13  ;;  %v188_v3 = vsel %vm187_vm8, %v183_v57, %v1243_v9  ;;  %v1503_v56 = vld [vmem:[#allocation2 + $0x68] sm:$0xff] }
  0xb3   :  { %v176_v62 = vsel %vm172_vm5, %v171_v58, %v114_v59  ;;  %v175_v63 = vsel %vm172_vm5, %v170_v60, %v112_v61  ;;  %v194_v13 = vsel %vm192_vm9, %v189_v4, %v1263_v16  ;;  %v193_v20 = vsel %vm192_vm9, %v188_v3, %v1265_v17  ;;  %v1511_v59 = vld [vmem:[#allocation2 + $0x90] sm:$0xff] }
  0xb4   :  { %v181_v1 = vsel %vm177_vm6, %v176_v62, %v1177_v2  ;;  %v180_v5 = vsel %vm177_vm6, %v175_v63, %v1171_v0  ;;  %376 = vrot.lane.b32.xlu1 %v1247_v10, %s1124_s0  ;;  %374 = vrot.lane.b32.xlu0 %v1249_v11, %s1124_s0 }
  0xb5   :  { %v186_v6 = vsel %vm182_vm7, %v181_v1, %v1177_v2  ;;  %v185_v7 = vsel %vm182_vm7, %v180_v5, %v1171_v0 }
  0xb6   :  { %v126_v9 = vpop.permute.xlu1 %125  ;;  %v124_v21 = vpop.permute.xlu0 %123  ;;  %v191_v2 = vsel %vm187_vm8, %v186_v6, %v1251_v12  ;;  %v190_v0 = vsel %vm187_vm8, %v185_v7, %v1241_v8 }
  0xb7   :  { %v199_v22 = vsel %vm197_vm10, %v194_v13, %v126_v9  ;;  %v198_v23 = vsel %vm197_vm10, %v193_v20, %v124_v21  ;;  %v196_v8 = vsel %vm192_vm9, %v191_v2, %v1271_v18 }
  0xb8   :  { %v204_v30 = vsel %vm202_vm11, %v199_v22, %v1287_v24  ;;  %v203_v16 = vsel %vm202_vm11, %v198_v23, %v1289_v25  ;;  %380 = vrot.lane.b32.xlu1 %v1259_v14, %s1124_s0  ;;  %378 = vrot.lane.b32.xlu0 %v1261_v15, %s1124_s0  ;;  %v195_v25 = vsel %vm192_vm9, %v190_v0, %v1273_v19 }
  0xb9   :  { %v209_v17 = vsel %vm207_vm12, %v204_v30, %v1303_v28  ;;  %v208_v12 = vsel %vm207_vm12, %v203_v16, %v1305_v29  ;;  %v1679_v29 = vld [vmem:[#allocation2 + $0x48] sm:$0xff] }
  0xba   :  { %1010 = vst [vmem:[#allocation5 + $0x28] sm:$0xff] %v209_v17  ;;  %1005 = vst [vmem:[#allocation5] sm:$0xff] %v208_v12  ;;  %v130_v24 = vpop.permute.xlu1 %129  ;;  %v128_v31 = vpop.permute.xlu0 %127 }
  0xbb   :  { %v201_v34 = vsel %vm197_vm10, %v196_v8, %v130_v24  ;;  %v200_v35 = vsel %vm197_vm10, %v195_v25, %v128_v31 }
  0xbc   :  { %v206_v36 = vsel %vm202_vm11, %v201_v34, %v1295_v26  ;;  %v205_v37 = vsel %vm202_vm11, %v200_v35, %v1297_v27  ;;  %388 = vrot.lane.b32.xlu1 %v1247_v10, %s1129_s25  ;;  %386 = vrot.lane.b32.xlu0 %v1249_v11, %s1129_s25 }
  0xbd   :  { %v211_v18 = vsel %vm207_vm12, %v206_v36, %v1317_v32  ;;  %v210_v19 = vsel %vm207_vm12, %v205_v37, %v1319_v33 }
  0xbe   :  { %1020 = vst [vmem:[#allocation5 + $0x78] sm:$0xff] %v211_v18  ;;  %1015 = vst [vmem:[#allocation5 + $0x50] sm:$0xff] %v210_v19  ;;  %v1431_v38 = vpop.permute.xlu1 %137  ;;  %v1433_v26 = vpop.permute.xlu0 %135 }
  0xbf   :  { %2298 = vst [vmem:[#allocation12_spill] sm:$0xff] %v1431_v38  ;;  %2299 = vst [vmem:[#allocation13_spill] sm:$0xff] %v1433_v26  ;;  %v1681_v26 = vld [vmem:[#allocation2 + $0x20] sm:$0xff] }
  0xc0   :  { %392 = vrot.lane.b32.xlu1 %v1259_v14, %s1129_s25  ;;  %390 = vrot.lane.b32.xlu0 %v1261_v15, %s1129_s25 }
  0xc2   :  { %v1439_v27 = vpop.permute.xlu1 %141  ;;  %v1441_v39 = vpop.permute.xlu0 %139 }
  0xc3   :  { %2300 = vst [vmem:[#allocation14_spill] sm:$0xff] %v1439_v27  ;;  %2301 = vst [vmem:[#allocation15_spill] sm:$0xff] %v1441_v39 }
  0xc4   :  { %460 = vrot.lane.b32.xlu1 %v1247_v10, %s1135_s2  ;;  %458 = vrot.lane.b32.xlu0 %v1249_v11, %s1135_s2 }
  0xc6   :  { %v1447_v40 = vpop.permute.xlu1 %223  ;;  %v1449_v41 = vpop.permute.xlu0 %221 }
  0xc8   :  { %464 = vrot.lane.b32.xlu1 %v1259_v14, %s1135_s2  ;;  %462 = vrot.lane.b32.xlu0 %v1261_v15, %s1135_s2 }
  0xca   :  { %v1455_v42 = vpop.permute.xlu1 %227  ;;  %v1457_v43 = vpop.permute.xlu0 %225 }
  0xcc   :  { %472 = vrot.lane.b32.xlu1 %v1247_v10, %s1136_s3  ;;  %470 = vrot.lane.b32.xlu0 %v1249_v11, %s1136_s3 }
  0xce   :  { %v1463_v44 = vpop.permute.xlu1 %235  ;;  %v1465_v45 = vpop.permute.xlu0 %233 }
  0xd0   :  { %476 = vrot.lane.b32.xlu1 %v1259_v14, %s1136_s3  ;;  %474 = vrot.lane.b32.xlu0 %v1261_v15, %s1136_s3 }
  0xd2   :  { %v1471_v46 = vpop.permute.xlu1 %239  ;;  %v1473_v47 = vpop.permute.xlu0 %237 }
  0xd4   :  { %484 = vrot.lane.b32.xlu1 %v1247_v10, %s1122_s17  ;;  %482 = vrot.lane.b32.xlu0 %v1249_v11, %s1122_s17 }
  0xd6   :  { %v1479_v48 = vpop.permute.xlu1 %247  ;;  %v1481_v49 = vpop.permute.xlu0 %245 }
  0xd8   :  { %488 = vrot.lane.b32.xlu1 %v1259_v14, %s1122_s17  ;;  %486 = vrot.lane.b32.xlu0 %v1261_v15, %s1122_s17 }
  0xda   :  { %v1489_v51 = vpop.permute.xlu1 %251  ;;  %v1491_v52 = vpop.permute.xlu0 %249 }
  0xdc   :  { %500 = vrot.lane.b32.xlu1 %v1487_v50, %s1137_s4  ;;  %498 = vrot.lane.b32.xlu0 %v1249_v11, %s1137_s4 }
  0xde   :  { %v1497_v54 = vpop.permute.xlu1 %259  ;;  %v1499_v55 = vpop.permute.xlu0 %257 }
  0xe0   :  { %504 = vrot.lane.b32.xlu1 %v1495_v53, %s1137_s4  ;;  %502 = vrot.lane.b32.xlu0 %v1247_v10, %s1137_s4 }
  0xe2   :  { %v1505_v57 = vpop.permute.xlu1 %263  ;;  %v1507_v58 = vpop.permute.xlu0 %261 }
  0xe4   :  { %508 = vrot.lane.b32.xlu1 %v1503_v56, %s1137_s4  ;;  %506 = vrot.lane.b32.xlu0 %v1261_v15, %s1137_s4 }
  0xe6   :  { %v1513_v60 = vpop.permute.xlu1 %271  ;;  %v1515_v61 = vpop.permute.xlu0 %269 }
  0xe8   :  { %512 = vrot.lane.b32.xlu1 %v1511_v59, %s1137_s4  ;;  %510 = vrot.lane.b32.xlu0 %v1259_v14, %s1137_s4 }
  0xea   :  { %v1519_v62 = vpop.permute.xlu1 %275  ;;  %v1521_v63 = vpop.permute.xlu0 %273 }
  0xec   :  { %525 = vrot.lane.b32.xlu1 %v1247_v10, %s1138_s5  ;;  %523 = vrot.lane.b32.xlu0 %v1249_v11, %s1138_s5 }
  0xee   :  { %v1527_v4 = vpop.permute.xlu1 %283  ;;  %v1529_v3 = vpop.permute.xlu0 %281 }
  0xf0   :  { %529 = vrot.lane.b32.xlu1 %v1259_v14, %s1138_s5  ;;  %527 = vrot.lane.b32.xlu0 %v1261_v15, %s1138_s5 }
  0xf2   :  { %v1535_v1 = vpop.permute.xlu1 %287  ;;  %v1537_v5 = vpop.permute.xlu0 %285 }
  0xf4   :  { %537 = vrot.lane.b32.xlu1 %v1247_v10, %s1139_s6  ;;  %535 = vrot.lane.b32.xlu0 %v1249_v11, %s1139_s6 }
  0xf6   :  { %v1543_v6 = vpop.permute.xlu1 %295  ;;  %v1545_v7 = vpop.permute.xlu0 %293 }
  0xf8   :  { %541 = vrot.lane.b32.xlu1 %v1259_v14, %s1139_s6  ;;  %539 = vrot.lane.b32.xlu0 %v1261_v15, %s1139_s6 }
  0xfa   :  { %v1551_v9 = vpop.permute.xlu1 %299  ;;  %v1553_v13 = vpop.permute.xlu0 %297 }
  0xfc   :  { %549 = vrot.lane.b32.xlu1 %v1495_v53, %s1135_s2  ;;  %547 = vrot.lane.b32.xlu0 %v1487_v50, %s1135_s2 }
  0xfe   :  { %v1559_v10 = vpop.permute.xlu1 %311  ;;  %v1561_v11 = vpop.permute.xlu0 %309 }
 0x100   :  { %553 = vrot.lane.b32.xlu1 %v1511_v59, %s1135_s2  ;;  %551 = vrot.lane.b32.xlu0 %v1503_v56, %s1135_s2 }
 0x102   :  { %v1567_v14 = vpop.permute.xlu1 %315  ;;  %v1569_v15 = vpop.permute.xlu0 %313 }
 0x104   :  { %561 = vrot.lane.b32.xlu1 %v1495_v53, %s1136_s3  ;;  %559 = vrot.lane.b32.xlu0 %v1487_v50, %s1136_s3 }
 0x106   :  { %v1575_v20 = vpop.permute.xlu1 %323  ;;  %v1577_v21 = vpop.permute.xlu0 %321 }
 0x108   :  { %565 = vrot.lane.b32.xlu1 %v1511_v59, %s1136_s3  ;;  %563 = vrot.lane.b32.xlu0 %v1503_v56, %s1136_s3 }
 0x10a   :  { %v1583_v22 = vpop.permute.xlu1 %327  ;;  %v1585_v23 = vpop.permute.xlu0 %325 }
 0x10c   :  { %573 = vrot.lane.b32.xlu1 %v1495_v53, %s1122_s17  ;;  %571 = vrot.lane.b32.xlu0 %v1487_v50, %s1122_s17 }
 0x10e   :  { %v1591_v2 = vpop.permute.xlu1 %335  ;;  %v1593_v0 = vpop.permute.xlu0 %333 }
 0x110   :  { %577 = vrot.lane.b32.xlu1 %v1511_v59, %s1122_s17  ;;  %575 = vrot.lane.b32.xlu0 %v1503_v56, %s1122_s17 }
 0x112   :  { %v1599_v30 = vpop.permute.xlu1 %339  ;;  %v1601_v16 = vpop.permute.xlu0 %337 }
 0x113   :  { %2302 = vst [vmem:[#allocation16_spill] sm:$0xff] %v1599_v30  ;;  %2303 = vst [vmem:[#allocation17_spill] sm:$0xff] %v1601_v16 }
 0x114   :  { %589 = vrot.lane.b32.xlu1 %v1495_v53, %s1138_s5  ;;  %587 = vrot.lane.b32.xlu0 %v1487_v50, %s1138_s5 }
 0x116   :  { %v1607_v17 = vpop.permute.xlu1 %347  ;;  %v1609_v12 = vpop.permute.xlu0 %345 }
 0x118   :  { %593 = vrot.lane.b32.xlu1 %v1511_v59, %s1138_s5  ;;  %591 = vrot.lane.b32.xlu0 %v1503_v56, %s1138_s5 }
 0x11a   :  { %v1615_v8 = vpop.permute.xlu1 %351  ;;  %v1617_v24 = vpop.permute.xlu0 %349 }
 0x11b   :  { %2304 = vst [vmem:[#allocation18_spill] sm:$0xff] %v1615_v8  ;;  %2305 = vst [vmem:[#allocation19_spill] sm:$0xff] %v1617_v24 }
 0x11c   :  { %601 = vrot.lane.b32.xlu1 %v1495_v53, %s1139_s6  ;;  %599 = vrot.lane.b32.xlu0 %v1487_v50, %s1139_s6 }
 0x11e   :  { %v1623_v25 = vpop.permute.xlu1 %364  ;;  %v1625_v31 = vpop.permute.xlu0 %362 }
 0x11f   :  { %2306 = vst [vmem:[#allocation20_spill] sm:$0xff] %v1623_v25 }
 0x120   :  { %605 = vrot.lane.b32.xlu1 %v1511_v59, %s1139_s6  ;;  %603 = vrot.lane.b32.xlu0 %v1503_v56, %s1139_s6 }
 0x122   :  { %v1631_v34 = vpop.permute.xlu1 %368  ;;  %v1633_v35 = vpop.permute.xlu0 %366 }
 0x123   :  { %2307 = vst [vmem:[#allocation21_spill] sm:$0xff] %v1631_v34  ;;  %2308 = vst [vmem:[#allocation22_spill] sm:$0xff] %v1633_v35 }
 0x124   :  { %613 = vrot.lane.b32.xlu1 %v1495_v53, %s1131_s27  ;;  %611 = vrot.lane.b32.xlu0 %v1487_v50, %s1131_s27 }
 0x126   :  { %v1639_v36 = vpop.permute.xlu1 %376  ;;  %v1641_v37 = vpop.permute.xlu0 %374 }
 0x127   :  { %2309 = vst [vmem:[#allocation23_spill] sm:$0xff] %v1639_v36 }
 0x128   :  { %617 = vrot.lane.b32.xlu1 %v1511_v59, %s1131_s27  ;;  %615 = vrot.lane.b32.xlu0 %v1503_v56, %s1131_s27 }
 0x12a   :  { %v1647_v18 = vpop.permute.xlu1 %380  ;;  %v1649_v19 = vpop.permute.xlu0 %378 }
 0x12b   :  { %2310 = vst [vmem:[#allocation24_spill] sm:$0xff] %v1647_v18  ;;  %2311 = vst [vmem:[#allocation25_spill] sm:$0xff] %v1649_v19  ;;  %v1691_v18 = vld [vmem:[#allocation2 + $0x98] sm:$0xff] }
 0x12c   :  { %685 = vrot.lane.b32.xlu1 %v1495_v53, %s1140_s7  ;;  %683 = vrot.lane.b32.xlu0 %v1487_v50, %s1140_s7 }
 0x12e   :  { %v1655_v32 = vpop.permute.xlu1 %388  ;;  %v1657_v27 = vpop.permute.xlu0 %386 }
 0x12f   :  { %2312 = vst [vmem:[#allocation26_spill] sm:$0xff] %v1655_v32 }
 0x130   :  { %689 = vrot.lane.b32.xlu1 %v1511_v59, %s1140_s7  ;;  %687 = vrot.lane.b32.xlu0 %v1503_v56, %s1140_s7 }
 0x132   :  { %v1663_v33 = vpop.permute.xlu1 %392  ;;  %v1665_v39 = vpop.permute.xlu0 %390 }
 0x133   :  { %2313 = vst [vmem:[#allocation27_spill] sm:$0xff] %v1663_v33  ;;  %2314 = vst [vmem:[#allocation28_spill] sm:$0xff] %v1665_v39  ;;  %v1693_v39 = vld [vmem:[#allocation2 + $0x70] sm:$0xff] }
 0x134   :  { %697 = vrot.lane.b32.xlu1 %v1495_v53, %s1141_s8  ;;  %695 = vrot.lane.b32.xlu0 %v1487_v50, %s1141_s8 }
 0x136   :  { %v1671_v28 = vpop.permute.xlu1 %460  ;;  %v1673_v38 = vpop.permute.xlu0 %458 }
 0x137   :  { %2315 = vst [vmem:[#allocation29_spill] sm:$0xff] %v1671_v28 }
 0x138   :  { %701 = vrot.lane.b32.xlu1 %v1511_v59, %s1141_s8  ;;  %699 = vrot.lane.b32.xlu0 %v1503_v56, %s1141_s8 }
 0x13a   :  { %v1683_v33 = vpop.permute.xlu1 %464  ;;  %v1685_v34 = vpop.permute.xlu0 %462 }
 0x13b   :  { %2316 = vst [vmem:[#allocation30_spill] sm:$0xff] %v1683_v33  ;;  %2317 = vst [vmem:[#allocation31_spill] sm:$0xff] %v1685_v34 }
 0x13c   :  { %713 = vrot.lane.b32.xlu1 %v1679_v29, %s1128_s24  ;;  %711 = vrot.lane.b32.xlu0 %v1681_v26, %s1128_s24 }
 0x13e   :  { %v1695_v35 = vpop.permute.xlu1 %472  ;;  %v1697_v19 = vpop.permute.xlu0 %470 }
 0x13f   :  { %2318 = vst [vmem:[#allocation32_spill] sm:$0xff] %v1695_v35 }
 0x140   :  { %717 = vrot.lane.b32.xlu1 %v1691_v18, %s1128_s24  ;;  %715 = vrot.lane.b32.xlu0 %v1693_v39, %s1128_s24 }
 0x142   :  { %v1703_v33 = vpop.permute.xlu1 %476  ;;  %v1705_v8 = vpop.permute.xlu0 %474 }
 0x143   :  { %2319 = vst [vmem:[#allocation33_spill] sm:$0xff] %v1703_v33  ;;  %2320 = vst [vmem:[#allocation34_spill] sm:$0xff] %v1705_v8 }
 0x144   :  { %725 = vrot.lane.b32.xlu1 %v1679_v29, %s1142_s9  ;;  %723 = vrot.lane.b32.xlu0 %v1681_v26, %s1142_s9 }
 0x146   :  { %v1709_v34 = vpop.permute.xlu1 %484  ;;  %v1711_v16 = vpop.permute.xlu0 %482 }
 0x147   :  { %2321 = vst [vmem:[#allocation35_spill] sm:$0xff] %v1709_v34 }
 0x148   :  { %729 = vrot.lane.b32.xlu1 %v1691_v18, %s1142_s9  ;;  %727 = vrot.lane.b32.xlu0 %v1693_v39, %s1142_s9 }
 0x14a   :  { %v1715_v32 = vpop.permute.xlu1 %488  ;;  %v1717_v24 = vpop.permute.xlu0 %486 }
 0x14b   :  { %2322 = vst [vmem:[#allocation36_spill] sm:$0xff] %v1715_v32  ;;  %2323 = vst [vmem:[#allocation37_spill] sm:$0xff] %v1717_v24 }
 0x14c   :  { %737 = vrot.lane.b32.xlu1 %v1495_v53, %s1143_s10  ;;  %735 = vrot.lane.b32.xlu0 %v1487_v50, %s1143_s10 }
 0x14e   :  { %v1723_v33 = vpop.permute.xlu1 %500  ;;  %v1725_v8 = vpop.permute.xlu0 %498 }
 0x150   :  { %741 = vrot.lane.b32.xlu1 %v1511_v59, %s1143_s10  ;;  %739 = vrot.lane.b32.xlu0 %v1503_v56, %s1143_s10 }
 0x152   :  { %v1731_v32 = vpop.permute.xlu1 %504  ;;  %v1733_v24 = vpop.permute.xlu0 %502 }
 0x154   :  { %749 = vrot.lane.b32.xlu1 %v1681_v26, %s1144_s11  ;;  %747 = vrot.lane.b32.xlu0 %v1487_v50, %s1144_s11 }
 0x156   :  { %v1737_v34 = vpop.permute.xlu1 %508  ;;  %v1739_v25 = vpop.permute.xlu0 %506 }
 0x157   :  { %2324 = vst [vmem:[#allocation38_spill] sm:$0xff] %v1739_v25 }
 0x158   :  { %753 = vrot.lane.b32.xlu1 %v1679_v29, %s1144_s11  ;;  %751 = vrot.lane.b32.xlu0 %v1495_v53, %s1144_s11 }
 0x15a   :  { %v1743_v36 = vpop.permute.xlu1 %512  ;;  %v1745_v30 = vpop.permute.xlu0 %510 }
 0x15b   :  { %2325 = vst [vmem:[#allocation39_spill] sm:$0xff] %v1743_v36  ;;  %2326 = vst [vmem:[#allocation40_spill] sm:$0xff] %v1745_v30 }
 0x15c   :  { %757 = vrot.lane.b32.xlu1 %v1693_v39, %s1144_s11  ;;  %755 = vrot.lane.b32.xlu0 %v1503_v56, %s1144_s11 }
 0x15e   :  { %v1749_v28 = vpop.permute.xlu1 %525  ;;  %v1751_v35 = vpop.permute.xlu0 %523 }
 0x160   :  { %761 = vrot.lane.b32.xlu1 %v1691_v18, %s1144_s11  ;;  %759 = vrot.lane.b32.xlu0 %v1511_v59, %s1144_s11 }
 0x162   :  { %v1755_v50 = vpop.permute.xlu1 %529  ;;  %v1757_v25 = vpop.permute.xlu0 %527 }
 0x163   :  { %2327 = vst [vmem:[#allocation41_spill] sm:$0xff] %v1755_v50  ;;  %2328 = vst [vmem:[#allocation42_spill] sm:$0xff] %v1757_v25 }
 0x164   :  { %774 = vrot.lane.b32.xlu1 %v1679_v29, %s1122_s17  ;;  %772 = vrot.lane.b32.xlu0 %v1681_v26, %s1122_s17 }
 0x166   :  { %v1763_v53 = vpop.permute.xlu1 %537  ;;  %v1765_v56 = vpop.permute.xlu0 %535 }
 0x167   :  { %2329 = vst [vmem:[#allocation43_spill] sm:$0xff] %v1763_v53  ;;  %v400_v53 = vsel %vm147_vm0, %v1457_v43, %v1473_v47 }
 0x168   :  { %778 = vrot.lane.b32.xlu1 %v1691_v18, %s1122_s17  ;;  %776 = vrot.lane.b32.xlu0 %v1693_v39, %s1122_s17 }
 0x16a   :  { %v1771_v59 = vpop.permute.xlu1 %541  ;;  %v1773_v50 = vpop.permute.xlu0 %539 }
 0x16b   :  { %2330 = vst [vmem:[#allocation44_spill] sm:$0xff] %v1771_v59  ;;  %2331 = vst [vmem:[#allocation45_spill] sm:$0xff] %v1773_v50  ;;  %v399_v50 = vsel %vm147_vm0, %v1447_v40, %v1463_v44 }
 0x16c   :  { %786 = vrot.lane.b32.xlu1 %v1679_v29, %s1140_s7  ;;  %784 = vrot.lane.b32.xlu0 %v1681_v26, %s1140_s7 }
 0x16e   :  { %v1779_v25 = vpop.permute.xlu1 %549  ;;  %v1781_v30 = vpop.permute.xlu0 %547 }
 0x16f   :  { %2332 = vst [vmem:[#allocation46_spill] sm:$0xff] %v1779_v25  ;;  %2333 = vst [vmem:[#allocation47_spill] sm:$0xff] %v1781_v30  ;;  %v398_v25 = vsel %vm147_vm0, %v1449_v41, %v1465_v45  ;;  %v401_v30 = vsel %vm147_vm0, %v1455_v42, %v1471_v46  ;;  %v404_v45 = vsel %vm152_vm1, %v400_v53, %v1491_v52 }
 0x170   :  { %790 = vrot.lane.b32.xlu1 %v1691_v18, %s1140_s7  ;;  %788 = vrot.lane.b32.xlu0 %v1693_v39, %s1140_s7  ;;  %v405_v44 = vsel %vm152_vm1, %v401_v30, %v1489_v51 }
 0x172   :  { %v1787_v36 = vpop.permute.xlu1 %553  ;;  %v1789_v59 = vpop.permute.xlu0 %551 }
 0x173   :  { %2334 = vst [vmem:[#allocation48_spill] sm:$0xff] %v1787_v36  ;;  %2335 = vst [vmem:[#allocation49_spill] sm:$0xff] %v1789_v59  ;;  %v403_v36 = vsel %vm152_vm1, %v399_v50, %v1479_v48  ;;  %v402_v59 = vsel %vm152_vm1, %v398_v25, %v1481_v49  ;;  %v409_v48 = vsel %vm157_vm2, %v405_v44, %v1505_v57 }
 0x174   :  { %798 = vrot.lane.b32.xlu1 %v1679_v29, %s1141_s8  ;;  %796 = vrot.lane.b32.xlu0 %v1681_v26, %s1141_s8  ;;  %v407_v46 = vsel %vm157_vm2, %v403_v36, %v1497_v54  ;;  %v406_v47 = vsel %vm157_vm2, %v402_v59, %v1499_v55  ;;  %v408_v49 = vsel %vm157_vm2, %v404_v45, %v1507_v58 }
 0x175   :  { %v411_v51 = vsel %vm162_vm3, %v407_v46, %v1513_v60  ;;  %v410_v30 = vsel %vm162_vm3, %v406_v47, %v1515_v61  ;;  %v413_v52 = vsel %vm162_vm3, %v409_v48, %v1519_v62  ;;  %v412_v55 = vsel %vm162_vm3, %v408_v49, %v1521_v63 }
 0x176   :  { %v1829_v25 = vpop.permute.xlu1 %561  ;;  %v1831_v54 = vpop.permute.xlu0 %559  ;;  %v415_v57 = vsel %vm167_vm4, %v411_v51, %v1527_v4  ;;  %v414_v58 = vsel %vm167_vm4, %v410_v30, %v1529_v3  ;;  %v417_v36 = vsel %vm167_vm4, %v413_v52, %v1535_v1  ;;  %v416_v50 = vsel %vm167_vm4, %v412_v55, %v1537_v5  ;;  %v2338_v55 = vld [vmem:[#allocation16_spill] sm:$0xff] }
 0x177   :  { %v419_v53 = vsel %vm172_vm5, %v415_v57, %v1543_v6  ;;  %v418_v59 = vsel %vm172_vm5, %v414_v58, %v1545_v7  ;;  %v421_v4 = vsel %vm172_vm5, %v417_v36, %v1551_v9  ;;  %v420_v3 = vsel %vm172_vm5, %v416_v50, %v1553_v13  ;;  %v2339_v58 = vld [vmem:[#allocation23_spill] sm:$0xff]  ;;  %v2340_v36 = vld [vmem:[#allocation20_spill] sm:$0xff] }
 0x178   :  { %802 = vrot.lane.b32.xlu1 %v1691_v18, %s1141_s8  ;;  %800 = vrot.lane.b32.xlu0 %v1693_v39, %s1141_s8  ;;  %v423_v6 = vsel %vm177_vm6, %v419_v53, %v1447_v40  ;;  %v422_v7 = vsel %vm177_vm6, %v418_v59, %v1449_v41  ;;  %v425_v44 = vsel %vm177_vm6, %v421_v4, %v1455_v42  ;;  %v2341_v53 = vld [vmem:[#allocation35_spill] sm:$0xff] }
 0x179   :  { %v424_v45 = vsel %vm177_vm6, %v420_v3, %v1457_v43  ;;  %v427_v9 = vsel %vm182_vm7, %v423_v6, %v1447_v40  ;;  %v426_v13 = vsel %vm182_vm7, %v422_v7, %v1449_v41  ;;  %v354_v40 = vsel %vm353_vm13, %v1515_v61, %v1609_v12  ;;  %v2342_v3 = vld [vmem:[#allocation19_spill] sm:$0xff] }
 0x17a   :  { %v1855_v1 = vpop.permute.xlu1 %565  ;;  %v1857_v5 = vpop.permute.xlu0 %563  ;;  %v430_v48 = vsel %vm187_vm8, %v426_v13, %v1561_v11  ;;  %v431_v41 = vsel %vm187_vm8, %v427_v9, %v1559_v10  ;;  %v515_v11 = vsel %vm514_vm14, %v1725_v8, %v1723_v33  ;;  %v623_v10 = vsel %vm147_vm0, %v1673_v38, %v1697_v19  ;;  %v2344_v9 = vld [vmem:[#allocation38_spill] sm:$0xff] }
 0x17b   :  { %v434_v49 = vsel %vm192_vm9, %v430_v48, %v1577_v21  ;;  %v435_v12 = vsel %vm192_vm9, %v431_v41, %v1575_v20  ;;  %v355_v38 = vsel %vm353_vm13, %v1513_v60, %v1607_v17  ;;  %v2336_v17 = vld [vmem:[#allocation32_spill] sm:$0xff]  ;;  %v451_v50 = vsel %vm147_vm0, %v2340_v36, %v2339_v58  ;;  %v2347_v41 = vld [vmem:[#allocation31_spill] sm:$0xff] }
 0x17c   :  { %810 = vrot.lane.b32.xlu1 %v1679_v29, %s1143_s10  ;;  %808 = vrot.lane.b32.xlu0 %v1681_v26, %s1143_s10  ;;  %v429_v29 = vsel %vm182_vm7, %v425_v44, %v1455_v42  ;;  %v428_v26 = vsel %vm182_vm7, %v424_v45, %v1457_v43  ;;  %v438_v61 = vsel %vm197_vm10, %v434_v49, %v1593_v0 }
 0x17d   :  { %v433_v42 = vsel %vm187_vm8, %v429_v29, %v1567_v14  ;;  %v432_v43 = vsel %vm187_vm8, %v428_v26, %v1569_v15  ;;  %v442_v8 = vsel %vm202_vm11, %v438_v61, %v354_v40  ;;  %v627_v14 = vsel %vm152_vm1, %v623_v10, %v1711_v16  ;;  %v2346_v40 = vld [vmem:[#allocation34_spill] sm:$0xff] }
 0x17e   :  { %v1875_v46 = vpop.permute.xlu1 %573  ;;  %v1877_v47 = vpop.permute.xlu0 %571  ;;  %v631_v19 = vsel %vm157_vm2, %v627_v14, %v515_v11  ;;  %v446_v51 = vsel %vm207_vm12, %v442_v8, %v1625_v31  ;;  %v516_v16 = vsel %vm514_vm14, %v1733_v24, %v1731_v32  ;;  %v439_v60 = vsel %vm197_vm10, %v435_v12, %v1591_v2  ;;  %v2348_v11 = vld [vmem:[#allocation43_spill] sm:$0xff]  ;;  %v2350_v61 = vld [vmem:[#allocation18_spill] sm:$0xff]  ;;  %v2351_v12 = vld [vmem:[#allocation25_spill] sm:$0xff] }
 0x17f   :  { %v635_v30 = vsel %vm162_vm3, %v631_v19, %v1751_v35  ;;  %v443_v57 = vsel %vm202_vm11, %v439_v60, %v355_v38  ;;  %v356_v6 = vsel %vm353_vm13, %v1521_v63, %v2342_v3  ;;  %v517_v13 = vsel %vm514_vm14, %v2344_v9, %v1737_v34  ;;  %v2345_v63 = vld [vmem:[#allocation17_spill] sm:$0xff]  ;;  %v2352_v8 = vld [vmem:[#allocation22_spill] sm:$0xff] }
 0x180   :  { %814 = vrot.lane.b32.xlu1 %v1691_v18, %s1143_s10  ;;  %812 = vrot.lane.b32.xlu0 %v1693_v39, %s1143_s10  ;;  %v450_v39 = vsel %vm147_vm0, %v1625_v31, %v1641_v37  ;;  %v437_v37 = vsel %vm192_vm9, %v433_v42, %v1583_v22  ;;  %v2337_v31 = vld [vmem:[#allocation29_spill] sm:$0xff]  ;;  %v639_v24 = vsel %vm167_vm4, %v635_v30, %v1765_v56  ;;  %v2343_v56 = vld [vmem:[#allocation26_spill] sm:$0xff]  ;;  %v2356_v30 = vld [vmem:[#allocation40_spill] sm:$0xff] }
 0x181   :  { %v454_v0 = vsel %vm216_vm15, %v450_v39, %v1657_v27  ;;  %v436_v27 = vsel %vm192_vm9, %v432_v43, %v1585_v23  ;;  %v624_v52 = vsel %vm147_vm0, %v2337_v31, %v2336_v17  ;;  %v441_v35 = vsel %vm197_vm10, %v437_v37, %v2338_v55  ;;  %v2349_v43 = vld [vmem:[#allocation47_spill] sm:$0xff]  ;;  %v2353_v14 = vld [vmem:[#allocation37_spill] sm:$0xff]  ;;  %v2357_v17 = vld [vmem:[#allocation42_spill] sm:$0xff] }
 0x182   :  { %v1916_v15 = vpop.permute.xlu1 %577  ;;  %v1918_v18 = vpop.permute.xlu0 %575  ;;  %v628_v59 = vsel %vm152_vm1, %v624_v52, %v2341_v53  ;;  %v455_v7 = vsel %vm216_vm15, %v451_v50, %v2343_v56  ;;  %v447_v45 = vsel %vm207_vm12, %v443_v57, %v2340_v36  ;;  %v643_v29 = vsel %vm172_vm5, %v639_v24, %v1577_v21  ;;  %v2358_v55 = vld [vmem:[#allocation33_spill] sm:$0xff]  ;;  %v2359_v57 = vld [vmem:[#allocation30_spill] sm:$0xff] }
 0x183   :  { %v632_v44 = vsel %vm157_vm2, %v628_v59, %v516_v16  ;;  %v440_v26 = vsel %vm197_vm10, %v436_v27, %v2345_v63  ;;  %v625_v49 = vsel %vm147_vm0, %v2347_v41, %v2346_v40  ;;  %v357_v21 = vsel %vm353_vm13, %v1519_v62, %v2350_v61  ;;  %v2355_v16 = vld [vmem:[#allocation39_spill] sm:$0xff]  ;;  %v2360_v36 = vld [vmem:[#allocation45_spill] sm:$0xff]  ;;  %v2361_v53 = vld [vmem:[#allocation46_spill] sm:$0xff] }
 0x184   :  { %894 = vrot.lane.b32.xlu1 %v454_v0, %s1140_s7  ;;  %892 = vrot.lane.b32.xlu0 %v446_v51, %s1140_s7  ;;  %v636_v48 = vsel %vm162_vm3, %v632_v44, %v1749_v28  ;;  %v647_v28 = vsel %vm177_vm6, %v643_v29, %v2349_v43  ;;  %v444_v10 = vsel %vm202_vm11, %v440_v26, %v356_v6  ;;  %v2354_v51 = vld [vmem:[#allocation28_spill] sm:$0xff]  ;;  %v2363_v56 = vld [vmem:[#allocation21_spill] sm:$0xff]  ;;  %v2365_v29 = vld [vmem:[#allocation27_spill] sm:$0xff]  ;;  %vm763_vm13 = vcmask 392192  }
 0x185   :  { %v640_v42 = vsel %vm167_vm4, %v636_v48, %v2348_v11  ;;  %v452_v39 = vsel %vm147_vm0, %v2352_v8, %v2351_v12  ;;  %v629_v38 = vsel %vm152_vm1, %v625_v49, %v2353_v14  ;;  %v518_v27 = vsel %vm514_vm14, %v2356_v30, %v2355_v16  ;;  %v2362_v6 = vld [vmem:[#allocation24_spill] sm:$0xff] }
 0x186   :  { %v1954_v2 = vpop.permute.xlu1 %589  ;;  %v588_v4 = vpop.permute.xlu0 %587  ;;  %v456_v37 = vsel %vm216_vm15, %v452_v39, %v2354_v51  ;;  %v633_v62 = vsel %vm157_vm2, %v629_v38, %v517_v13  ;;  %v448_v60 = vsel %vm207_vm12, %v444_v10, %v2352_v8  ;;  %v644_v52 = vsel %vm172_vm5, %v640_v42, %v1575_v20  ;;  %v2364_v44 = vld [vmem:[#allocation36_spill] sm:$0xff]  ;;  %v2368_v42 = vld [vmem:[#allocation49_spill] sm:$0xff] }
 0x187   :  { %v637_v31 = vsel %vm162_vm3, %v633_v62, %v2357_v17  ;;  %v651_v24 = vsel %vm182_vm7, %v647_v28, %v2349_v43  ;;  %v626_v58 = vsel %vm147_vm0, %v2359_v57, %v2358_v55  ;;  %v648_v59 = vsel %vm177_vm6, %v644_v52, %v2361_v53 }
 0x188   :  { %898 = vrot.lane.b32.xlu1 %v455_v7, %s1140_s7  ;;  %896 = vrot.lane.b32.xlu0 %v447_v45, %s1140_s7  ;;  %v641_v50 = vsel %vm167_vm4, %v637_v31, %v2360_v36  ;;  %v655_v20 = vsel %vm187_vm8, %v651_v24, %v1831_v54  ;;  %v445_v3 = vsel %vm202_vm11, %v441_v35, %v357_v21  ;;  %v2366_v35 = vld [vmem:[#allocation41_spill] sm:$0xff] }
 0x189   :  { %v453_v7 = vsel %vm147_vm0, %v2363_v56, %v2362_v6  ;;  %v630_v45 = vsel %vm152_vm1, %v626_v58, %v2364_v44  ;;  %v659_v9 = vsel %vm192_vm9, %v655_v20, %v1877_v47  ;;  %v449_v54 = vsel %vm207_vm12, %v445_v3, %v2363_v56  ;;  %v2367_v47 = vld [vmem:[#allocation44_spill] sm:$0xff] }
 0x18a   :  { %v1991_v0 = vpop.permute.xlu1 %593  ;;  %v592_v19 = vpop.permute.xlu0 %591  ;;  %v457_v63 = vsel %vm216_vm15, %v453_v7, %v2365_v29  ;;  %v634_v26 = vsel %vm157_vm2, %v630_v45, %v518_v27  ;;  %v645_v41 = vsel %vm172_vm5, %v641_v50, %v1585_v23  ;;  %v652_v49 = vsel %vm182_vm7, %v648_v59, %v2361_v53 }
 0x18b   :  { %v638_v40 = vsel %vm162_vm3, %v634_v26, %v2366_v35  ;;  %v649_v28 = vsel %vm177_vm6, %v645_v41, %v2368_v42  ;;  %v656_v61 = vsel %vm187_vm8, %v652_v49, %v1829_v25  ;;  %v663_v21 = vsel %vm197_vm10, %v659_v9, %v1723_v33  ;;  %v2369_v25 = vld [vmem:[#allocation48_spill] sm:$0xff] }
 0x18c   :  { %902 = vrot.lane.b32.xlu1 %v456_v37, %s1140_s7  ;;  %900 = vrot.lane.b32.xlu0 %v448_v60, %s1140_s7  ;;  %v642_v11 = vsel %vm167_vm4, %v638_v40, %v2367_v47  ;;  %v660_v23 = vsel %vm192_vm9, %v656_v61, %v1875_v46  ;;  %v667_v10 = vsel %vm202_vm11, %v663_v21, %v588_v4 }
 0x18d   :  { %v646_v14 = vsel %vm172_vm5, %v642_v11, %v1583_v22  ;;  %v653_v38 = vsel %vm182_vm7, %v649_v28, %v2368_v42  ;;  %v664_v4 = vsel %vm197_vm10, %v660_v23, %v1731_v32 }
 0x18e   :  { %v602_v13 = vpop.permute.xlu1 %601  ;;  %v600_v48 = vpop.permute.xlu0 %599  ;;  %v650_v33 = vsel %vm177_vm6, %v646_v14, %v2369_v25  ;;  %v657_v46 = vsel %vm187_vm8, %v653_v38, %v1857_v5  ;;  %v668_v22 = vsel %vm202_vm11, %v664_v4, %v1954_v2 }
 0x18f   :  { %v671_v39 = vsel %vm207_vm12, %v667_v10, %v600_v48  ;;  %v661_v51 = vsel %vm192_vm9, %v657_v46, %v1918_v18  ;;  %v672_v27 = vsel %vm207_vm12, %v668_v22, %v602_v13  ;;  %v654_v60 = vsel %vm182_vm7, %v650_v33, %v2369_v25 }
 0x190   :  { %906 = vrot.lane.b32.xlu1 %v457_v63, %s1140_s7  ;;  %904 = vrot.lane.b32.xlu0 %v449_v54, %s1140_s7  ;;  %v658_v5 = vsel %vm187_vm8, %v654_v60, %v1855_v1  ;;  %v665_v18 = vsel %vm197_vm10, %v661_v51, %v1737_v34 }
 0x191   :  { %v662_v17 = vsel %vm192_vm9, %v658_v5, %v1916_v15  ;;  %v669_v31 = vsel %vm202_vm11, %v665_v18, %v592_v19 }
 0x192   :  { %v606_v12 = vpop.permute.xlu1 %605  ;;  %v604_v8 = vpop.permute.xlu0 %603  ;;  %v666_v34 = vsel %vm197_vm10, %v662_v17, %v2355_v16 }
 0x193   :  { %v673_v55 = vsel %vm207_vm12, %v669_v31, %v604_v8  ;;  %v670_v15 = vsel %vm202_vm11, %v666_v34, %v1991_v0 }
 0x194   :  { %928 = vrot.lane.b32.xlu0 %v671_v39, %s1135_s2  ;;  %v674_v58 = vsel %vm207_vm12, %v670_v15, %v606_v12 }
 0x196   :  { %v614_v37 = vpop.permute.xlu1 %613  ;;  %v612_v30 = vpop.permute.xlu0 %611 }
 0x197   :  { %v675_v62 = vsel %vm147_vm0, %v600_v48, %v612_v30  ;;  %v676_v2 = vsel %vm147_vm0, %v602_v13, %v614_v37 }
 0x198   :  { %932 = vrot.lane.b32.xlu0 %v672_v27, %s1135_s2  ;;  %v679_v32 = vsel %vm216_vm15, %v675_v62, %v2349_v43  ;;  %v680_v1 = vsel %vm216_vm15, %v676_v2, %v2361_v53 }
 0x199   :  { %930 = vrot.lane.b32.xlu1 %v679_v32, %s1135_s2 }
 0x19a   :  { %v618_v52 = vpop.permute.xlu1 %617  ;;  %v616_v24 = vpop.permute.xlu0 %615 }
 0x19b   :  { %v677_v43 = vsel %vm147_vm0, %v604_v8, %v616_v24  ;;  %v678_v50 = vsel %vm147_vm0, %v606_v12, %v618_v52 }
 0x19c   :  { %936 = vrot.lane.b32.xlu0 %v673_v55, %s1135_s2  ;;  %v681_v36 = vsel %vm216_vm15, %v677_v43, %v2368_v42  ;;  %v682_v59 = vsel %vm216_vm15, %v678_v50, %v2369_v25 }
 0x19d   :  { %934 = vrot.lane.b32.xlu1 %v680_v1, %s1135_s2 }
 0x19e   :  { %v686_v19 = vpop.permute.xlu1 %685  ;;  %v684_v57 = vpop.permute.xlu0 %683 }
 0x1a0   :  { %940 = vrot.lane.b32.xlu0 %v674_v58, %s1135_s2 }
 0x1a1   :  { %938 = vrot.lane.b32.xlu1 %v681_v36, %s1135_s2 }
 0x1a2   :  { %v690_v16 = vpop.permute.xlu1 %689  ;;  %v688_v53 = vpop.permute.xlu0 %687 }
 0x1a5   :  { %942 = vrot.lane.b32.xlu1 %v682_v59, %s1135_s2 }
 0x1a6   :  { %v698_v0 = vpop.permute.xlu1 %697  ;;  %v696_v20 = vpop.permute.xlu0 %695 }
 0x1a7   :  { %v824_v14 = vsel %vm147_vm0, %v684_v57, %v696_v20  ;;  %v825_v46 = vsel %vm147_vm0, %v686_v19, %v698_v0 }
 0x1aa   :  { %v702_v3 = vpop.permute.xlu1 %701  ;;  %v700_v6 = vpop.permute.xlu0 %699 }
 0x1ab   :  { %v827_v56 = vsel %vm147_vm0, %v690_v16, %v702_v3  ;;  %v826_v7 = vsel %vm147_vm0, %v688_v53, %v700_v6 }
 0x1ae   :  { %v2103_v44 = vpop.permute.xlu1 %713  ;;  %v2105_v45 = vpop.permute.xlu0 %711 }
 0x1af   :  { %v828_v4 = vsel %vm152_vm1, %v824_v14, %v2105_v45  ;;  %v829_v37 = vsel %vm152_vm1, %v825_v46, %v2103_v44 }
 0x1b2   :  { %v2107_v9 = vpop.permute.xlu1 %717  ;;  %v2109_v13 = vpop.permute.xlu0 %715 }
 0x1b3   :  { %v831_v30 = vsel %vm152_vm1, %v827_v56, %v2107_v9  ;;  %v830_v27 = vsel %vm152_vm1, %v826_v7, %v2109_v13  ;;  %vm944_vm1 = vcmask 523264  }
 0x1b6   :  { %v2111_v48 = vpop.permute.xlu1 %725  ;;  %v2113_v29 = vpop.permute.xlu0 %723 }
 0x1b7   :  { %v832_v62 = vsel %vm157_vm2, %v828_v4, %v2113_v29  ;;  %v833_v60 = vsel %vm157_vm2, %v829_v37, %v2111_v48 }
 0x1ba   :  { %v2115_v63 = vpop.permute.xlu1 %729  ;;  %v2117_v26 = vpop.permute.xlu0 %727 }
 0x1bb   :  { %v835_v32 = vsel %vm157_vm2, %v831_v30, %v2115_v63  ;;  %v834_v1 = vsel %vm157_vm2, %v830_v27, %v2117_v26 }
 0x1be   :  { %v738_v54 = vpop.permute.xlu1 %737  ;;  %v736_v35 = vpop.permute.xlu0 %735 }
 0x1bf   :  { %v836_v5 = vsel %vm162_vm3, %v832_v62, %v736_v35  ;;  %v837_v34 = vsel %vm162_vm3, %v833_v60, %v738_v54  ;;  %v2371_v60 = vld [vmem:[#allocation9_spill] sm:$0xff] }
 0x1c2   :  { %v742_v40 = vpop.permute.xlu1 %741  ;;  %v740_v41 = vpop.permute.xlu0 %739 }
 0x1c3   :  { %v839_v19 = vsel %vm162_vm3, %v835_v32, %v742_v40  ;;  %v838_v57 = vsel %vm162_vm3, %v834_v1, %v740_v41 }
 0x1c6   :  { %v2119_v49 = vpop.permute.xlu1 %749  ;;  %v748_v47 = vpop.permute.xlu0 %747 }
 0x1c7   :  { %v764_v51 = vsel %vm763_vm13, %v748_v47, %v2119_v49 }
 0x1c8   :  { %v840_v52 = vsel %vm167_vm4, %v836_v5, %v764_v51 }
 0x1ca   :  { %v2121_v11 = vpop.permute.xlu1 %753  ;;  %v752_v42 = vpop.permute.xlu0 %751 }
 0x1cb   :  { %v765_v18 = vsel %vm763_vm13, %v752_v42, %v2121_v11 }
 0x1cc   :  { %v841_v58 = vsel %vm167_vm4, %v837_v34, %v765_v18  ;;  %v1068_v18 = vld [vmem:[#allocation2 + $0x8] sm:$0xff]  ;;  %v1069_v34 = vld [vmem:[#allocation2 + $0x30] sm:$0xff] }
 0x1ce   :  { %v2123_v28 = vpop.permute.xlu1 %757  ;;  %v756_v61 = vpop.permute.xlu0 %755 }
 0x1cf   :  { %v766_v2 = vsel %vm763_vm13, %v756_v61, %v2123_v28 }
 0x1d0   :  { %v842_v53 = vsel %vm167_vm4, %v838_v57, %v766_v2  ;;  %v2375_v57 = vld [vmem:[#allocation11_spill] sm:$0xff] }
 0x1d2   :  { %v2125_v21 = vpop.permute.xlu1 %761  ;;  %v760_v23 = vpop.permute.xlu0 %759 }
 0x1d3   :  { %v767_v17 = vsel %vm763_vm13, %v760_v23, %v2125_v21 }
 0x1d4   :  { %v843_v16 = vsel %vm167_vm4, %v839_v19, %v767_v17  ;;  %v2374_v19 = vld [vmem:[#allocation15_spill] sm:$0xff] }
 0x1d6   :  { %v775_v10 = vpop.permute.xlu1 %774  ;;  %v773_v12 = vpop.permute.xlu0 %772 }
 0x1d7   :  { %v876_v38 = vsel %vm147_vm0, %v2119_v49, %v773_v12  ;;  %v877_v31 = vsel %vm147_vm0, %v2121_v11, %v775_v10  ;;  %v844_v43 = vsel %vm172_vm5, %v840_v52, %v773_v12  ;;  %v845_v50 = vsel %vm172_vm5, %v841_v58, %v775_v10  ;;  %v2373_v52 = vld [vmem:[#allocation8_spill] sm:$0xff] }
 0x1d8   :  { %v214_v58 = vsel %vm147_vm0, %v2375_v57, %v2374_v19 }
 0x1da   :  { %v779_v8 = vpop.permute.xlu1 %778  ;;  %v777_v39 = vpop.permute.xlu0 %776 }
 0x1db   :  { %v847_v59 = vsel %vm172_vm5, %v843_v16, %v779_v8  ;;  %v846_v0 = vsel %vm172_vm5, %v842_v53, %v777_v39  ;;  %v878_v20 = vsel %vm147_vm0, %v2123_v28, %v777_v39  ;;  %v879_v42 = vsel %vm147_vm0, %v2125_v21, %v779_v8 }
 0x1de   :  { %v787_v25 = vpop.permute.xlu1 %786  ;;  %v785_v33 = vpop.permute.xlu0 %784 }
 0x1df   :  { %v880_v22 = vsel %vm216_vm15, %v876_v38, %v785_v33  ;;  %v881_v15 = vsel %vm216_vm15, %v877_v31, %v787_v25  ;;  %v848_v36 = vsel %vm177_vm6, %v844_v43, %v785_v33  ;;  %v849_v3 = vsel %vm177_vm6, %v845_v50, %v787_v25  ;;  %v2372_v31 = vld [vmem:[#allocation12_spill] sm:$0xff] }
 0x1e0   :  { %967 = vrot.lane.b32.xlu1 %v880_v22, %s1129_s25  ;;  %v852_v7 = vsel %vm182_vm7, %v848_v36, %v785_v33  ;;  %v853_v47 = vsel %vm182_vm7, %v849_v3, %v787_v25 }
 0x1e2   :  { %v791_v24 = vpop.permute.xlu1 %790  ;;  %v789_v55 = vpop.permute.xlu0 %788 }
 0x1e3   :  { %v851_v54 = vsel %vm177_vm6, %v847_v59, %v791_v24  ;;  %v850_v35 = vsel %vm177_vm6, %v846_v0, %v789_v55  ;;  %v882_v40 = vsel %vm216_vm15, %v878_v20, %v789_v55  ;;  %v883_v25 = vsel %vm216_vm15, %v879_v42, %v791_v24  ;;  %v2376_v59 = vld [vmem:[#allocation14_spill] sm:$0xff] }
 0x1e4   :  { %971 = vrot.lane.b32.xlu1 %v881_v15, %s1129_s25  ;;  %v855_v61 = vsel %vm182_vm7, %v851_v54, %v791_v24  ;;  %v854_v23 = vsel %vm182_vm7, %v850_v35, %v789_v55  ;;  %v213_v24 = vsel %vm147_vm0, %v2373_v52, %v2372_v31  ;;  %v2377_v0 = vld [vmem:[#allocation10_spill] sm:$0xff] }
 0x1e5   :  { %v218_v43 = vsel %vm216_vm15, %v213_v24, %v1069_v34  ;;  %v215_v20 = vsel %vm147_vm0, %v2377_v0, %v2376_v59 }
 0x1e6   :  { %v799_v6 = vpop.permute.xlu1 %798  ;;  %v797_v56 = vpop.permute.xlu0 %796 }
 0x1e7   :  { %v856_v41 = vsel %vm187_vm8, %v852_v7, %v797_v56  ;;  %v857_v10 = vsel %vm187_vm8, %v853_v47, %v799_v6  ;;  %v1071_v56 = vld [vmem:[#allocation2 + $0x80] sm:$0xff] }
 0x1e8   :  { %975 = vrot.lane.b32.xlu1 %v882_v40, %s1129_s25  ;;  %v860_v14 = vsel %vm192_vm9, %v856_v41, %v2105_v45  ;;  %v861_v4 = vsel %vm192_vm9, %v857_v10, %v2103_v44  ;;  %v2370_v44 = vld [vmem:[#allocation13_spill] sm:$0xff]  ;;  %v220_v7 = vsel %vm216_vm15, %v215_v20, %v1071_v56 }
 0x1e9   :  { %v864_v45 = vsel %vm197_vm10, %v860_v14, %v2113_v29  ;;  %v865_v30 = vsel %vm197_vm10, %v861_v4, %v2111_v48  ;;  %v212_v32 = vsel %vm147_vm0, %v2371_v60, %v2370_v44 }
 0x1ea   :  { %v803_v12 = vpop.permute.xlu1 %802  ;;  %v801_v39 = vpop.permute.xlu0 %800  ;;  %v217_v2 = vsel %vm216_vm15, %v212_v32, %v1068_v18 }
 0x1eb   :  { %v859_v38 = vsel %vm187_vm8, %v855_v61, %v803_v12  ;;  %v858_v33 = vsel %vm187_vm8, %v854_v23, %v801_v39 }
 0x1ec   :  { %v863_v8 = vsel %vm192_vm9, %v859_v38, %v2107_v9  ;;  %v862_v46 = vsel %vm192_vm9, %v858_v33, %v2109_v13  ;;  %979 = vrot.lane.b32.xlu1 %v883_v25, %s1129_s25 }
 0x1ed   :  { %v866_v29 = vsel %vm197_vm10, %v862_v46, %v2117_v26  ;;  %v867_v26 = vsel %vm197_vm10, %v863_v8, %v2115_v63 }
 0x1ee   :  { %v811_v51 = vpop.permute.xlu1 %810  ;;  %v809_v22 = vpop.permute.xlu0 %808 }
 0x1ef   :  { %v868_v37 = vsel %vm202_vm11, %v864_v45, %v809_v22  ;;  %v869_v13 = vsel %vm202_vm11, %v865_v30, %v811_v51 }
 0x1f0   :  { %v872_v9 = vsel %vm207_vm12, %v868_v37, %v2119_v49  ;;  %v873_v5 = vsel %vm207_vm12, %v869_v13, %v2121_v11 }
 0x1f1   :  { %965 = vrot.lane.b32.xlu0 %v872_v9, %s1129_s25 }
 0x1f2   :  { %v815_v27 = vpop.permute.xlu1 %814  ;;  %v813_v62 = vpop.permute.xlu0 %812 }
 0x1f3   :  { %v870_v48 = vsel %vm202_vm11, %v866_v29, %v813_v62  ;;  %v871_v1 = vsel %vm202_vm11, %v867_v26, %v815_v27 }
 0x1f4   :  { %v874_v11 = vsel %vm207_vm12, %v870_v48, %v2123_v28  ;;  %v875_v63 = vsel %vm207_vm12, %v871_v1, %v2125_v21  ;;  %v1070_v28 = vld [vmem:[#allocation2 + $0x58] sm:$0xff] }
 0x1f5   :  { %969 = vrot.lane.b32.xlu0 %v873_v5, %s1129_s25  ;;  %v219_v16 = vsel %vm216_vm15, %v214_v58, %v1070_v28 }
 0x1f6   :  { %v895_v49 = vpop.permute.xlu1 %894  ;;  %v893_v17 = vpop.permute.xlu0 %892 }
 0x1f7   :  { %v993_v55 = vsel %vm162_vm3, %v217_v2, %v893_v17  ;;  %v908_v35 = vsel %vm162_vm3, %v893_v17, %v895_v49 }
 0x1f8   :  { %1006 = vst [vmem:[#allocation5 + $0x8] sm:$0xff] %v993_v55 }
 0x1f9   :  { %973 = vrot.lane.b32.xlu0 %v874_v11, %s1129_s25 }
 0x1fa   :  { %v897_v15 = vpop.permute.xlu0 %896  ;;  %v899_v36 = vpop.permute.xlu1 %898 }
 0x1fb   :  { %v994_v50 = vsel %vm162_vm3, %v218_v43, %v897_v15  ;;  %v909_v42 = vsel %vm162_vm3, %v897_v15, %v899_v36 }
 0x1fc   :  { %1011 = vst [vmem:[#allocation5 + $0x30] sm:$0xff] %v994_v50 }
 0x1fd   :  { %977 = vrot.lane.b32.xlu0 %v875_v63, %s1129_s25 }
 0x1fe   :  { %v901_v53 = vpop.permute.xlu0 %900  ;;  %v903_v6 = vpop.permute.xlu1 %902 }
 0x1ff   :  { %v995_v3 = vsel %vm162_vm3, %v219_v16, %v901_v53  ;;  %v910_v39 = vsel %vm162_vm3, %v901_v53, %v903_v6 }
 0x200   :  { %1016 = vst [vmem:[#allocation5 + $0x58] sm:$0xff] %v995_v3 }
 0x202   :  { %v905_v54 = vpop.permute.xlu0 %904  ;;  %v907_v41 = vpop.permute.xlu1 %906 }
 0x203   :  { %v996_v21 = vsel %vm162_vm3, %v220_v7, %v905_v54  ;;  %v911_v8 = vsel %vm162_vm3, %v905_v54, %v907_v41 }
 0x204   :  { %1021 = vst [vmem:[#allocation5 + $0x80] sm:$0xff] %v996_v21 }
 0x206   :  { %v929_v40 = vpop.permute.xlu0 %928 }
 0x207   :  { %v997_v47 = vsel %vm944_vm1, %v908_v35, %v929_v40 }
 0x208   :  { %1007 = vst [vmem:[#allocation5 + $0x10] sm:$0xff] %v997_v47 }
 0x20a   :  { %v933_v61 = vpop.permute.xlu0 %932 }
 0x20b   :  { %v998_v23 = vsel %vm944_vm1, %v909_v42, %v933_v61  ;;  %v931_v10 = vpop.permute.xlu1 %930 }
 0x20c   :  { %1012 = vst [vmem:[#allocation5 + $0x38] sm:$0xff] %v998_v23  ;;  %v945_v12 = vsel %vm944_vm1, %v929_v40, %v931_v10 }
 0x20e   :  { %v937_v14 = vpop.permute.xlu0 %936 }
 0x20f   :  { %v999_v38 = vsel %vm944_vm1, %v910_v39, %v937_v14  ;;  %v935_v33 = vpop.permute.xlu1 %934 }
 0x210   :  { %1017 = vst [vmem:[#allocation5 + $0x60] sm:$0xff] %v999_v38  ;;  %v946_v25 = vsel %vm944_vm1, %v933_v61, %v935_v33 }
 0x212   :  { %v941_v46 = vpop.permute.xlu0 %940 }
 0x213   :  { %v1000_v4 = vsel %vm944_vm1, %v911_v8, %v941_v46  ;;  %v939_v51 = vpop.permute.xlu1 %938 }
 0x214   :  { %1022 = vst [vmem:[#allocation5 + $0x88] sm:$0xff] %v1000_v4  ;;  %v947_v45 = vsel %vm944_vm1, %v937_v14, %v939_v51 }
 0x217   :  { %v943_v22 = vpop.permute.xlu1 %942 }
 0x218   :  { %v948_v49 = vsel %vm944_vm1, %v941_v46, %v943_v22 }
 0x252   :  { %v968_v37 = vpop.permute.xlu1 %967 }
 0x256   :  { %v972_v30 = vpop.permute.xlu1 %971 }
 0x25a   :  { %v976_v32 = vpop.permute.xlu1 %975 }
 0x25e   :  { %v980_v18 = vpop.permute.xlu1 %979 }
 0x263   :  { %v966_v9 = vpop.permute.xlu0 %965 }
 0x264   :  { %v981_v13 = vsel %vm192_vm9, %v966_v9, %v968_v37  ;;  %v1001_v27 = vsel %vm192_vm9, %v945_v12, %v966_v9 }
 0x265   :  { %1008 = vst [vmem:[#allocation5 + $0x18] sm:$0xff] %v1001_v27  ;;  %1009 = vst [vmem:[#allocation5 + $0x20] sm:$0xff] %v981_v13 }
 0x267   :  { %v970_v62 = vpop.permute.xlu0 %969 }
 0x268   :  { %v982_v44 = vsel %vm192_vm9, %v970_v62, %v972_v30  ;;  %v1002_v60 = vsel %vm192_vm9, %v946_v25, %v970_v62 }
 0x269   :  { %1013 = vst [vmem:[#allocation5 + $0x40] sm:$0xff] %v1002_v60  ;;  %1014 = vst [vmem:[#allocation5 + $0x48] sm:$0xff] %v982_v44 }
 0x26b   :  { %v974_v29 = vpop.permute.xlu0 %973 }
 0x26c   :  { %v983_v5 = vsel %vm192_vm9, %v974_v29, %v976_v32  ;;  %v1003_v48 = vsel %vm192_vm9, %v947_v45, %v974_v29 }
 0x26d   :  { %1018 = vst [vmem:[#allocation5 + $0x68] sm:$0xff] %v1003_v48  ;;  %1019 = vst [vmem:[#allocation5 + $0x70] sm:$0xff] %v983_v5 }
 0x26f   :  { %v978_v2 = vpop.permute.xlu0 %977 }
 0x270   :  { %v984_v17 = vsel %vm192_vm9, %v978_v2, %v980_v18  ;;  %v1004_v31 = vsel %vm192_vm9, %v948_v49, %v978_v2 }
 0x271   :  { %1023 = vst [vmem:[#allocation5 + $0x90] sm:$0xff] %v1004_v31  ;;  %1024 = vst [vmem:[#allocation5 + $0x98] sm:$0xff] %v984_v17 }
 0x272   :  { %1105 = shalt.err (!%p1102_p12)
}
 0x273   :  { %s1106_s19 = scalar_lea.hbm %s2281_s1, 2560 }
 0x274   :  { %p1107_p13 = scmp.ne.s32.totalorder %s2281_s1, %s1106_s19  ;;  %p1110_p0 = scmp.lt.u32.totalorder %s1106_s19, %s2281_s1 }
 0x276   :  { %p1112_p1 = pnand %p1110_p0, %p1107_p13 }
 0x278   :  { %1115 = shalt.err (!%p1112_p1)
}
 0x279   :  { %1036 = dma.vmem_to_hbm [thread:$0]  %s1031_s13, 2560, %s2281_s1, [#allocation4], %s1121_s16, %s1121_s16, %s1122_s17  }
 0x27a   :  { %1118 = dma.done.wait [#allocation4], 2560  }
 0x27b   :  { %1119 = vsyncadd [#allocation4], 4294964736 }
 0x27c   :  { %1040 = vsyncpa [#allocation3], 1 }
 0x27d   :  { %1041 = vsyncpa [#allocation4], 1 }

</bundles_post_ra>
